<compile_context>
chip_gen: v5e
topology: v5e:2x2
jax: 0.10.0
libtpu: 0.0.40
codegen_flags: <defaults>
</compile_context>

<pallas_src>
import math
from functools import partial

import jax
import jax.numpy as jnp
from jax.experimental import pallas as pl
from jax.experimental.pallas import tpu as pltpu

LN_EPS = 1e-5             # PyTorch nn.LayerNorm default eps
MXU_DTYPE = jnp.bfloat16  # MXU input dtype (accumulation forced to f32)


# ----------------------------- math helpers ---------------------------------
def _layernorm(x, w, eps=LN_EPS):
    """LayerNorm over the last axis (f32 stats), elementwise scale, no bias."""
    x = x.astype(jnp.float32)
    mu = jnp.mean(x, axis=-1, keepdims=True)
    xc = x - mu
    var = jnp.mean(xc * xc, axis=-1, keepdims=True)
    return xc * jax.lax.rsqrt(var + eps) * w


def _gelu_tanh(x):
    # tanh-approximate GELU: tanh runs on the EUP (its own VLIW slot) instead of
    # burning VPU slots on an erf polynomial.  Differs from exact erf-GELU by <~5e-4.
    c = math.sqrt(2.0 / math.pi)
    return 0.5 * x * (1.0 + jnp.tanh(c * (x + 0.044715 * x * x * x)))


def _softmax_lastdim(x):
    m = jnp.max(x, axis=-1, keepdims=True)
    e = jnp.exp(x - m)
    return e * pl.reciprocal(jnp.sum(e, axis=-1, keepdims=True), approx=True)


# ------------------------------ Pallas kernel --------------------------------
def _transformer_kernel(heads, dim_head, bt,
                        x_ref, ln1_ref, wqkv_ref, qn_ref, kn_ref, wo_ref,
                        ln2_ref, w1_ref, b1_ref, w2_ref, b2_ref, lnf_ref,
                        o_ref, xs_ref):
    """All transformer blocks for one batch tile, fused across the depth grid axis."""
    layer = pl.program_id(1)
    n_layers = pl.num_programs(1)

    _, n_seq, dim = x_ref.shape
    m_rows = bt * n_seq
    dh = dim_head
    dim_inner = heads * dh
    scale = 1.0 / math.sqrt(dh)

    # Load the batch tile once (layer 0); afterwards it stays resident in VMEM.
    @pl.when(layer == 0)
    def _():
        xs_ref[...] = x_ref[...].reshape(m_rows, dim).astype(jnp.float32)

    x = xs_ref[...]                                              # (M, D) f32 residual stream

    # ---------------- attention branch ----------------
    h = _layernorm(x, ln1_ref[0])
    # Fused Q/K/V projection: one MXU matmul instead of three.
    qkv = jnp.dot(h.astype(MXU_DTYPE), wqkv_ref[0],
                  preferred_element_type=jnp.float32)            # (M, 3*H*Dh)
    q = qkv[:, :dim_inner]
    k = qkv[:, dim_inner:2 * dim_inner]
    v = qkv[:, 2 * dim_inner:]

    def to_heads(t):
        # (rows, H*Dh) -> (H, rows, Dh) via static lane slices + leading-axis stack.
        # TODO(synk): pltpu.einshape("nhd->hnd", ...) would avoid per-head lane
        # shifts; slice+stack kept for lowering robustness.
        return jnp.stack([t[:, i * dh:(i + 1) * dh] for i in range(heads)], axis=0)

    # Head-batched qk-normed attention; 1/sqrt(Dh) folded into the query-norm weight.
    row_outs = []
    for b in range(bt):                                          # tiny static loop over rows in tile
        rows = slice(b * n_seq, (b + 1) * n_seq)
        qh = _layernorm(to_heads(q[rows]), qn_ref[0] * scale)    # (H, N, Dh)
        kh = _layernorm(to_heads(k[rows]), kn_ref[0])
        vh = to_heads(v[rows])
        s = jnp.einsum("hqd,hkd->hqk",
                       qh.astype(MXU_DTYPE), kh.astype(MXU_DTYPE),
                       preferred_element_type=jnp.float32)       # (H, N, N)
        p = _softmax_lastdim(s)
        ob = jnp.einsum("hqk,hkd->hqd",
                        p.astype(MXU_DTYPE), vh.astype(MXU_DTYPE),
                        preferred_element_type=jnp.float32)      # (H, N, Dh)
        row_outs.append(jnp.concatenate([ob[i] for i in range(heads)], axis=-1))
    attn_out = row_outs[0] if bt == 1 else jnp.concatenate(row_outs, axis=0)   # (M, H*Dh)

    x = x + jnp.dot(attn_out.astype(MXU_DTYPE), wo_ref[0],
                    preferred_element_type=jnp.float32)

    # ---------------- feed-forward branch ----------------
    h2 = _layernorm(x, ln2_ref[0])
    h2 = jnp.dot(h2.astype(MXU_DTYPE), w1_ref[0],
                 preferred_element_type=jnp.float32) + b1_ref[0]
    h2 = _gelu_tanh(h2)
    h2 = jnp.dot(h2.astype(MXU_DTYPE), w2_ref[0],
                 preferred_element_type=jnp.float32) + b2_ref[0]
    x = x + h2

    xs_ref[...] = x

    # Final LayerNorm fused into the last layer's iteration; output block is
    # resident across the depth axis and flushed to HBM once per batch tile.
    @pl.when(layer == n_layers - 1)
    def _():
        o_ref[...] = _layernorm(x, lnf_ref[...]).reshape(bt, n_seq, dim).astype(o_ref.dtype)


# ------------------------------ host wrappers --------------------------------
def transformer_forward(x, params, *, heads, dim_head, block_batch=1):
    B, N, D = x.shape
    depth = params["ln1"].shape[0]
    bt = block_batch
    assert B % bt == 0, (B, bt)

    weight_names = ("ln1", "wqkv", "qn", "kn", "wo", "ln2", "w1", "b1", "w2", "b2")
    weights = [params[name] for name in weight_names]

    x_spec = pl.BlockSpec((bt, N, D), lambda b, l: (b, 0, 0))
    w_specs = [pl.BlockSpec((1,) + w.shape[1:], lambda b, l: (l, 0, 0)) for w in weights]
    lnf_spec = pl.BlockSpec(params["final_norm"].shape, lambda b, l: (0, 0))

    return pl.pallas_call(
        partial(_transformer_kernel, heads, dim_head, bt),
        out_shape=jax.ShapeDtypeStruct((B, N, D), jnp.float32),
        grid=(B // bt, depth),                       # batch tiles (parallel), depth (arbitrary, last)
        in_specs=[x_spec] + w_specs + [lnf_spec],
        out_specs=x_spec,
        scratch_shapes=[pltpu.VMEM((bt * N, D), jnp.float32)],   # resident residual stream
        compiler_params=pltpu.CompilerParams(
            dimension_semantics=("parallel", "arbitrary"),
            vmem_limit_bytes=48 * 1024 * 1024),      # explicit budget; fits v5e/v6e/v7x scoped VMEM
    )(x, *weights, params["final_norm"])


def transformer_reference(x, params, *, heads, dim_head):
    """Pure-JAX f32 reference mirroring the PyTorch forward (eval mode, dropout=0)."""
    B, N, D = x.shape
    depth = params["ln1"].shape[0]
    dim_inner = heads * dim_head
    scale = 1.0 / math.sqrt(dim_head)
    f32 = lambda a: a.astype(jnp.float32)
    for l in range(depth):
        h = _layernorm(x, params["ln1"][l])
        qkv = h @ f32(params["wqkv"][l])
        q = qkv[..., :dim_inner]
        k = qkv[..., dim_inner:2 * dim_inner]
        v = qkv[..., 2 * dim_inner:]
        split = lambda t: t.reshape(B, N, heads, dim_head).transpose(0, 2, 1, 3)
        qh, kh, vh = split(q), split(k), split(v)
        qh = _layernorm(qh, params["qn"][l])
        kh = _layernorm(kh, params["kn"][l])
        s = jnp.einsum("bhqd,bhkd->bhqk", qh, kh) * scale
        p = jax.nn.softmax(s, axis=-1)
        o = jnp.einsum("bhqk,bhkd->bhqd", p, vh)
        o = o.transpose(0, 2, 1, 3).reshape(B, N, dim_inner)
        x = x + o @ f32(params["wo"][l])
        h2 = _layernorm(x, params["ln2"][l])
        h2 = jax.nn.gelu(h2 @ f32(params["w1"][l]) + params["b1"][l], approximate=False)
        x = x + h2 @ f32(params["w2"][l]) + params["b2"][l]
    return _layernorm(x, params["final_norm"])


def init_params(key, *, depth, dim, heads, dim_head, mlp_dim):
    dim_inner = heads * dim_head
    ks = jax.random.split(key, 11)
    ln = lambda k, n: 1.0 + 0.02 * jax.random.normal(k, (depth, 1, n), jnp.float32)
    mm = lambda k, i, o: (0.05 * jax.random.normal(k, (depth, i, o), jnp.float32)).astype(MXU_DTYPE)
    return {
        "ln1": ln(ks[0], dim),                         # attn.norm.weight
        "wqkv": mm(ks[1], dim, 3 * dim_inner),         # to_queries | to_keys | to_values (fused)
        "qn": ln(ks[2], dim_head),                     # query_norm.weight
        "kn": ln(ks[3], dim_head),                     # key_norm.weight
        "wo": mm(ks[4], dim_inner, dim),               # to_out
        "ln2": ln(ks[5], dim),                         # ff LayerNorm.weight
        "w1": mm(ks[6], dim, mlp_dim),                 # ff Linear1 W
        "b1": 0.02 * jax.random.normal(ks[7], (depth, 1, mlp_dim), jnp.float32),
        "w2": mm(ks[8], mlp_dim, dim),                 # ff Linear2 W
        "b2": 0.02 * jax.random.normal(ks[9], (depth, 1, dim), jnp.float32),
        "final_norm": 1.0 + 0.02 * jax.random.normal(ks[10], (1, dim), jnp.float32),
    }


if __name__ == "__main__":
    # Small, forward-consistent shapes.
    B, N = 4, 8                 # batch, sequence length
    dim, depth = 32, 2
    heads, dim_head = 4, 8
    mlp_dim = 64

    key = jax.random.PRNGKey(0)
    key, kx = jax.random.split(key)
    x = jax.random.normal(kx, (B, N, dim), jnp.float32)
    params = init_params(key, depth=depth, dim=dim, heads=heads,
                         dim_head=dim_head, mlp_dim=mlp_dim)

    out = jax.block_until_ready(
        transformer_forward(x, params, heads=heads, dim_head=dim_head, block_batch=2))
    ref = jax.block_until_ready(
        transformer_reference(x, params, heads=heads, dim_head=dim_head))

    assert out.shape == (B, N, dim), out.shape
    assert bool(jnp.all(jnp.isfinite(out)))
    max_err = float(jnp.max(jnp.abs(out - ref)))
    # bf16 MXU inputs + tanh-GELU + approx-reciprocal softmax vs f32/exact-erf reference.
    assert bool(jnp.allclose(out, ref, atol=2e-2, rtol=2e-2)), max_err
    print("KERNEL_OK")
</pallas_src>

<mosaic_0001>
module attributes {stable_mosaic.version = 11 : i64} {
  func.func @_transformer_kernel(%arg0: i32, %arg1: i32, %arg2: memref<2x8x32xf32, #tpu.memory_space<vmem>>, %arg3: memref<1x1x32xf32, #tpu.memory_space<vmem>>, %arg4: memref<1x32x96xbf16, #tpu.memory_space<vmem>>, %arg5: memref<1x1x8xf32, #tpu.memory_space<vmem>>, %arg6: memref<1x1x8xf32, #tpu.memory_space<vmem>>, %arg7: memref<1x32x32xbf16, #tpu.memory_space<vmem>>, %arg8: memref<1x1x32xf32, #tpu.memory_space<vmem>>, %arg9: memref<1x32x64xbf16, #tpu.memory_space<vmem>>, %arg10: memref<1x1x64xf32, #tpu.memory_space<vmem>>, %arg11: memref<1x64x32xbf16, #tpu.memory_space<vmem>>, %arg12: memref<1x1x32xf32, #tpu.memory_space<vmem>>, %arg13: memref<1x32xf32, #tpu.memory_space<vmem>>, %arg14: memref<2x8x32xf32, #tpu.memory_space<vmem>>, %arg15: memref<16x32xf32, #tpu.memory_space<vmem>>) attributes {dimension_semantics = [#tpu.dimension_semantics<parallel>, #tpu.dimension_semantics<arbitrary>], iteration_bounds = array<i64: 2, 2>, scalar_prefetch = 0 : i64, scratch_operands = 1 : i64, tpu.core_type = #tpu.core_type<tc>, window_params = [{transform_indices = @transform_0, window_bounds = array<i64: 2, 8, 32>}, {transform_indices = @transform_1, window_bounds = array<i64: 1, 1, 32>}, {transform_indices = @transform_2, window_bounds = array<i64: 1, 32, 96>}, {transform_indices = @transform_3, window_bounds = array<i64: 1, 1, 8>}, {transform_indices = @transform_4, window_bounds = array<i64: 1, 1, 8>}, {transform_indices = @transform_5, window_bounds = array<i64: 1, 32, 32>}, {transform_indices = @transform_6, window_bounds = array<i64: 1, 1, 32>}, {transform_indices = @transform_7, window_bounds = array<i64: 1, 32, 64>}, {transform_indices = @transform_8, window_bounds = array<i64: 1, 1, 64>}, {transform_indices = @transform_9, window_bounds = array<i64: 1, 64, 32>}, {transform_indices = @transform_10, window_bounds = array<i64: 1, 1, 32>}, {pipeline_mode = #tpu.pipeline_mode<synchronous>, transform_indices = @transform_11, window_bounds = array<i64: 1, 32>}, {transform_indices = @transform_12, window_bounds = array<i64: 2, 8, 32>}]} {
    %c0_i32 = arith.constant 0 : i32
    %0 = arith.cmpi eq, %arg1, %c0_i32 : i32
    %1 = arith.extui %0 : i1 to i32
    %c0_i32_0 = arith.constant 0 : i32
    %2 = arith.cmpi ne, %1, %c0_i32_0 : i32
    scf.if %2 {
      %c0_88 = arith.constant 0 : index
      %c0_89 = arith.constant 0 : index
      %c0_90 = arith.constant 0 : index
      %289 = vector.load %arg2[%c0_88, %c0_89, %c0_90] : memref<2x8x32xf32, #tpu.memory_space<vmem>>, vector<2x8x32xf32>
      %290 = vector.shape_cast %289 : vector<2x8x32xf32> to vector<16x32xf32>
      %c0_91 = arith.constant 0 : index
      %c0_92 = arith.constant 0 : index
      %291 = vector.load %arg15[%c0_91, %c0_92] : memref<16x32xf32, #tpu.memory_space<vmem>>, vector<16x32xf32>
      tpu.vector_store %arg15[%c0_91, %c0_92], %290 {strides = array<i32>} : memref<16x32xf32, #tpu.memory_space<vmem>>, vector<16x32xf32>,
    } else {
    }
    %c0 = arith.constant 0 : index
    %c0_1 = arith.constant 0 : index
    %3 = vector.load %arg15[%c0, %c0_1] : memref<16x32xf32, #tpu.memory_space<vmem>>, vector<16x32xf32>
    %c0_2 = arith.constant 0 : index
    %c0_3 = arith.constant 0 : index
    %c0_4 = arith.constant 0 : index
    %4 = vector.load %arg3[%c0_2, %c0_3, %c0_4] : memref<1x1x32xf32, #tpu.memory_space<vmem>>, vector<1x1x32xf32>
    %5 = vector.shape_cast %4 : vector<1x1x32xf32> to vector<1x32xf32>
    %cst = arith.constant dense<0.000000e+00> : vector<16xf32>
    %6 = vector.multi_reduction <add>, %3, %cst [1] : vector<16x32xf32> to vector<16xf32>
    %7 = vector.shape_cast %6 : vector<16xf32> to vector<16x1xf32>
    %cst_5 = arith.constant 3.200000e+01 : f32
    %8 = vector.broadcast %cst_5 : f32 to vector<16x1xf32>
    %9 = arith.divf %7, %8 : vector<16x1xf32>
    %10 = vector.broadcast %9 : vector<16x1xf32> to vector<16x32xf32>
    %11 = arith.subf %3, %10 : vector<16x32xf32>
    %12 = arith.mulf %11, %11 : vector<16x32xf32>
    %cst_6 = arith.constant dense<0.000000e+00> : vector<16xf32>
    %13 = vector.multi_reduction <add>, %12, %cst_6 [1] : vector<16x32xf32> to vector<16xf32>
    %14 = vector.shape_cast %13 : vector<16xf32> to vector<16x1xf32>
    %cst_7 = arith.constant 3.200000e+01 : f32
    %15 = vector.broadcast %cst_7 : f32 to vector<16x1xf32>
    %16 = arith.divf %14, %15 : vector<16x1xf32>
    %cst_8 = arith.constant 9.99999974E-6 : f32
    %17 = vector.broadcast %cst_8 : f32 to vector<16x1xf32>
    %18 = arith.addf %16, %17 : vector<16x1xf32>
    %19 = math.rsqrt %18 : vector<16x1xf32>
    %20 = vector.broadcast %19 : vector<16x1xf32> to vector<16x32xf32>
    %21 = arith.mulf %11, %20 : vector<16x32xf32>
    %22 = vector.broadcast %5 : vector<1x32xf32> to vector<16x32xf32>
    %23 = arith.mulf %21, %22 : vector<16x32xf32>
    %24 = arith.truncf %23 : vector<16x32xf32> to vector<16x32xbf16>
    %c0_9 = arith.constant 0 : index
    %c0_10 = arith.constant 0 : index
    %c0_11 = arith.constant 0 : index
    %25 = vector.load %arg4[%c0_9, %c0_10, %c0_11] : memref<1x32x96xbf16, #tpu.memory_space<vmem>>, vector<1x32x96xbf16>
    %26 = vector.shape_cast %25 : vector<1x32x96xbf16> to vector<32x96xbf16>
    %cst_12 = arith.constant dense<0.000000e+00> : vector<16x96xf32>
    %27 = tpu.matmul %24, %26, %cst_12 {dimension_numbers = #tpu.dot_dimension_numbers<[1], [0], [0], [1], [0, 0, 1, 1], [], []>} : vector<16x32xbf16>, vector<32x96xbf16>, vector<16x96xf32> -> vector<16x96xf32>
    %28 = vector.extract_strided_slice %27 {offsets = [0, 0], sizes = [16, 32], strides = [1, 1]} : vector<16x96xf32> to vector<16x32xf32>
    %29 = vector.extract_strided_slice %27 {offsets = [0, 32], sizes = [16, 32], strides = [1, 1]} : vector<16x96xf32> to vector<16x32xf32>
    %30 = vector.extract_strided_slice %27 {offsets = [0, 64], sizes = [16, 32], strides = [1, 1]} : vector<16x96xf32> to vector<16x32xf32>
    %31 = vector.extract_strided_slice %28 {offsets = [0, 0], sizes = [8, 32], strides = [1, 1]} : vector<16x32xf32> to vector<8x32xf32>
    %32 = vector.extract_strided_slice %31 {offsets = [0, 0], sizes = [8, 8], strides = [1, 1]} : vector<8x32xf32> to vector<8x8xf32>
    %33 = vector.extract_strided_slice %31 {offsets = [0, 8], sizes = [8, 8], strides = [1, 1]} : vector<8x32xf32> to vector<8x8xf32>
    %34 = vector.extract_strided_slice %31 {offsets = [0, 16], sizes = [8, 8], strides = [1, 1]} : vector<8x32xf32> to vector<8x8xf32>
    %35 = vector.extract_strided_slice %31 {offsets = [0, 24], sizes = [8, 8], strides = [1, 1]} : vector<8x32xf32> to vector<8x8xf32>
    %36 = vector.shape_cast %32 : vector<8x8xf32> to vector<1x8x8xf32>
    %37 = vector.shape_cast %33 : vector<8x8xf32> to vector<1x8x8xf32>
    %38 = vector.shape_cast %34 : vector<8x8xf32> to vector<1x8x8xf32>
    %39 = vector.shape_cast %35 : vector<8x8xf32> to vector<1x8x8xf32>
    %40 = tpu.concatenate %36, %37, %38, %39 in 0 : vector<1x8x8xf32>, vector<1x8x8xf32>, vector<1x8x8xf32>, vector<1x8x8xf32> -> vector<4x8x8xf32>
    %c0_13 = arith.constant 0 : index
    %c0_14 = arith.constant 0 : index
    %c0_15 = arith.constant 0 : index
    %41 = vector.load %arg5[%c0_13, %c0_14, %c0_15] : memref<1x1x8xf32, #tpu.memory_space<vmem>>, vector<1x1x8xf32>
    %42 = vector.shape_cast %41 : vector<1x1x8xf32> to vector<1x8xf32>
    %cst_16 = arith.constant 0.353553385 : f32
    %43 = vector.broadcast %cst_16 : f32 to vector<1x8xf32>
    %44 = arith.mulf %42, %43 : vector<1x8xf32>
    %cst_17 = arith.constant dense<0.000000e+00> : vector<4x8xf32>
    %45 = vector.multi_reduction <add>, %40, %cst_17 [2] : vector<4x8x8xf32> to vector<4x8xf32>
    %46 = vector.shape_cast %45 : vector<4x8xf32> to vector<4x8x1xf32>
    %cst_18 = arith.constant 8.000000e+00 : f32
    %47 = vector.broadcast %cst_18 : f32 to vector<4x8x1xf32>
    %48 = arith.divf %46, %47 : vector<4x8x1xf32>
    %49 = vector.broadcast %48 : vector<4x8x1xf32> to vector<4x8x8xf32>
    %50 = arith.subf %40, %49 : vector<4x8x8xf32>
    %51 = arith.mulf %50, %50 : vector<4x8x8xf32>
    %cst_19 = arith.constant dense<0.000000e+00> : vector<4x8xf32>
    %52 = vector.multi_reduction <add>, %51, %cst_19 [2] : vector<4x8x8xf32> to vector<4x8xf32>
    %53 = vector.shape_cast %52 : vector<4x8xf32> to vector<4x8x1xf32>
    %cst_20 = arith.constant 8.000000e+00 : f32
    %54 = vector.broadcast %cst_20 : f32 to vector<4x8x1xf32>
    %55 = arith.divf %53, %54 : vector<4x8x1xf32>
    %cst_21 = arith.constant 9.99999974E-6 : f32
    %56 = vector.broadcast %cst_21 : f32 to vector<4x8x1xf32>
    %57 = arith.addf %55, %56 : vector<4x8x1xf32>
    %58 = math.rsqrt %57 : vector<4x8x1xf32>
    %59 = vector.broadcast %58 : vector<4x8x1xf32> to vector<4x8x8xf32>
    %60 = arith.mulf %50, %59 : vector<4x8x8xf32>
    %61 = vector.shape_cast %44 : vector<1x8xf32> to vector<1x1x8xf32>
    %62 = vector.broadcast %61 : vector<1x1x8xf32> to vector<4x8x8xf32>
    %63 = arith.mulf %60, %62 : vector<4x8x8xf32>
    %64 = vector.extract_strided_slice %29 {offsets = [0, 0], sizes = [8, 32], strides = [1, 1]} : vector<16x32xf32> to vector<8x32xf32>
    %65 = vector.extract_strided_slice %64 {offsets = [0, 0], sizes = [8, 8], strides = [1, 1]} : vector<8x32xf32> to vector<8x8xf32>
    %66 = vector.extract_strided_slice %64 {offsets = [0, 8], sizes = [8, 8], strides = [1, 1]} : vector<8x32xf32> to vector<8x8xf32>
    %67 = vector.extract_strided_slice %64 {offsets = [0, 16], sizes = [8, 8], strides = [1, 1]} : vector<8x32xf32> to vector<8x8xf32>
    %68 = vector.extract_strided_slice %64 {offsets = [0, 24], sizes = [8, 8], strides = [1, 1]} : vector<8x32xf32> to vector<8x8xf32>
    %69 = vector.shape_cast %65 : vector<8x8xf32> to vector<1x8x8xf32>
    %70 = vector.shape_cast %66 : vector<8x8xf32> to vector<1x8x8xf32>
    %71 = vector.shape_cast %67 : vector<8x8xf32> to vector<1x8x8xf32>
    %72 = vector.shape_cast %68 : vector<8x8xf32> to vector<1x8x8xf32>
    %73 = tpu.concatenate %69, %70, %71, %72 in 0 : vector<1x8x8xf32>, vector<1x8x8xf32>, vector<1x8x8xf32>, vector<1x8x8xf32> -> vector<4x8x8xf32>
    %c0_22 = arith.constant 0 : index
    %c0_23 = arith.constant 0 : index
    %c0_24 = arith.constant 0 : index
    %74 = vector.load %arg6[%c0_22, %c0_23, %c0_24] : memref<1x1x8xf32, #tpu.memory_space<vmem>>, vector<1x1x8xf32>
    %75 = vector.shape_cast %74 : vector<1x1x8xf32> to vector<1x8xf32>
    %cst_25 = arith.constant dense<0.000000e+00> : vector<4x8xf32>
    %76 = vector.multi_reduction <add>, %73, %cst_25 [2] : vector<4x8x8xf32> to vector<4x8xf32>
    %77 = vector.shape_cast %76 : vector<4x8xf32> to vector<4x8x1xf32>
    %cst_26 = arith.constant 8.000000e+00 : f32
    %78 = vector.broadcast %cst_26 : f32 to vector<4x8x1xf32>
    %79 = arith.divf %77, %78 : vector<4x8x1xf32>
    %80 = vector.broadcast %79 : vector<4x8x1xf32> to vector<4x8x8xf32>
    %81 = arith.subf %73, %80 : vector<4x8x8xf32>
    %82 = arith.mulf %81, %81 : vector<4x8x8xf32>
    %cst_27 = arith.constant dense<0.000000e+00> : vector<4x8xf32>
    %83 = vector.multi_reduction <add>, %82, %cst_27 [2] : vector<4x8x8xf32> to vector<4x8xf32>
    %84 = vector.shape_cast %83 : vector<4x8xf32> to vector<4x8x1xf32>
    %cst_28 = arith.constant 8.000000e+00 : f32
    %85 = vector.broadcast %cst_28 : f32 to vector<4x8x1xf32>
    %86 = arith.divf %84, %85 : vector<4x8x1xf32>
    %cst_29 = arith.constant 9.99999974E-6 : f32
    %87 = vector.broadcast %cst_29 : f32 to vector<4x8x1xf32>
    %88 = arith.addf %86, %87 : vector<4x8x1xf32>
    %89 = math.rsqrt %88 : vector<4x8x1xf32>
    %90 = vector.broadcast %89 : vector<4x8x1xf32> to vector<4x8x8xf32>
    %91 = arith.mulf %81, %90 : vector<4x8x8xf32>
    %92 = vector.shape_cast %75 : vector<1x8xf32> to vector<1x1x8xf32>
    %93 = vector.broadcast %92 : vector<1x1x8xf32> to vector<4x8x8xf32>
    %94 = arith.mulf %91, %93 : vector<4x8x8xf32>
    %95 = vector.extract_strided_slice %30 {offsets = [0, 0], sizes = [8, 32], strides = [1, 1]} : vector<16x32xf32> to vector<8x32xf32>
    %96 = vector.extract_strided_slice %95 {offsets = [0, 0], sizes = [8, 8], strides = [1, 1]} : vector<8x32xf32> to vector<8x8xf32>
    %97 = vector.extract_strided_slice %95 {offsets = [0, 8], sizes = [8, 8], strides = [1, 1]} : vector<8x32xf32> to vector<8x8xf32>
    %98 = vector.extract_strided_slice %95 {offsets = [0, 16], sizes = [8, 8], strides = [1, 1]} : vector<8x32xf32> to vector<8x8xf32>
    %99 = vector.extract_strided_slice %95 {offsets = [0, 24], sizes = [8, 8], strides = [1, 1]} : vector<8x32xf32> to vector<8x8xf32>
    %100 = vector.shape_cast %96 : vector<8x8xf32> to vector<1x8x8xf32>
    %101 = vector.shape_cast %97 : vector<8x8xf32> to vector<1x8x8xf32>
    %102 = vector.shape_cast %98 : vector<8x8xf32> to vector<1x8x8xf32>
    %103 = vector.shape_cast %99 : vector<8x8xf32> to vector<1x8x8xf32>
    %104 = tpu.concatenate %100, %101, %102, %103 in 0 : vector<1x8x8xf32>, vector<1x8x8xf32>, vector<1x8x8xf32>, vector<1x8x8xf32> -> vector<4x8x8xf32>
    %105 = arith.truncf %63 : vector<4x8x8xf32> to vector<4x8x8xbf16>
    %106 = arith.truncf %94 : vector<4x8x8xf32> to vector<4x8x8xbf16>
    "tpu.trace_start"() <{level = 10 : i32, message = "hqd,hkd->hqk"}> : () -> ()
    %cst_30 = arith.constant dense<0.000000e+00> : vector<4x8x8xf32>
    %107 = tpu.matmul %105, %106, %cst_30 {dimension_numbers = #tpu.dot_dimension_numbers<[2], [2], [1], [1], [0, 0, 0, 1, 1, 1], [0], [0]>} : vector<4x8x8xbf16>, vector<4x8x8xbf16>, vector<4x8x8xf32> -> vector<4x8x8xf32>
    "tpu.trace_stop"() : () -> ()
    %cst_31 = arith.constant dense<0xFF800000> : vector<4x8xf32>
    %108 = vector.multi_reduction <maximumf>, %107, %cst_31 [2] : vector<4x8x8xf32> to vector<4x8xf32>
    %109 = vector.shape_cast %108 : vector<4x8xf32> to vector<4x8x1xf32>
    %110 = vector.broadcast %109 : vector<4x8x1xf32> to vector<4x8x8xf32>
    %111 = arith.subf %107, %110 : vector<4x8x8xf32>
    %112 = math.exp %111 : vector<4x8x8xf32>
    %cst_32 = arith.constant dense<0.000000e+00> : vector<4x8xf32>
    %113 = vector.multi_reduction <add>, %112, %cst_32 [2] : vector<4x8x8xf32> to vector<4x8xf32>
    %114 = vector.shape_cast %113 : vector<4x8xf32> to vector<4x8x1xf32>
    %115 = tpu.reciprocal %114 {approx = true} : vector<4x8x1xf32> -> vector<4x8x1xf32>
    %116 = vector.broadcast %115 : vector<4x8x1xf32> to vector<4x8x8xf32>
    %117 = arith.mulf %112, %116 : vector<4x8x8xf32>
    %118 = arith.truncf %117 : vector<4x8x8xf32> to vector<4x8x8xbf16>
    %119 = arith.truncf %104 : vector<4x8x8xf32> to vector<4x8x8xbf16>
    "tpu.trace_start"() <{level = 10 : i32, message = "hqk,hkd->hqd"}> : () -> ()
    %cst_33 = arith.constant dense<0.000000e+00> : vector<4x8x8xf32>
    %120 = tpu.matmul %118, %119, %cst_33 {dimension_numbers = #tpu.dot_dimension_numbers<[2], [1], [1], [2], [0, 0, 0, 1, 1, 2], [0], [0]>} : vector<4x8x8xbf16>, vector<4x8x8xbf16>, vector<4x8x8xf32> -> vector<4x8x8xf32>
    "tpu.trace_stop"() : () -> ()
    %121 = vector.extract_strided_slice %120 {offsets = [0, 0, 0], sizes = [1, 8, 8], strides = [1, 1, 1]} : vector<4x8x8xf32> to vector<1x8x8xf32>
    %122 = vector.shape_cast %121 : vector<1x8x8xf32> to vector<8x8xf32>
    %123 = vector.extract_strided_slice %120 {offsets = [1, 0, 0], sizes = [1, 8, 8], strides = [1, 1, 1]} : vector<4x8x8xf32> to vector<1x8x8xf32>
    %124 = vector.shape_cast %123 : vector<1x8x8xf32> to vector<8x8xf32>
    %125 = vector.extract_strided_slice %120 {offsets = [2, 0, 0], sizes = [1, 8, 8], strides = [1, 1, 1]} : vector<4x8x8xf32> to vector<1x8x8xf32>
    %126 = vector.shape_cast %125 : vector<1x8x8xf32> to vector<8x8xf32>
    %127 = vector.extract_strided_slice %120 {offsets = [3, 0, 0], sizes = [1, 8, 8], strides = [1, 1, 1]} : vector<4x8x8xf32> to vector<1x8x8xf32>
    %128 = vector.shape_cast %127 : vector<1x8x8xf32> to vector<8x8xf32>
    %129 = tpu.concatenate %122, %124, %126, %128 in 1 : vector<8x8xf32>, vector<8x8xf32>, vector<8x8xf32>, vector<8x8xf32> -> vector<8x32xf32>
    %130 = vector.extract_strided_slice %28 {offsets = [8, 0], sizes = [8, 32], strides = [1, 1]} : vector<16x32xf32> to vector<8x32xf32>
    %131 = vector.extract_strided_slice %130 {offsets = [0, 0], sizes = [8, 8], strides = [1, 1]} : vector<8x32xf32> to vector<8x8xf32>
    %132 = vector.extract_strided_slice %130 {offsets = [0, 8], sizes = [8, 8], strides = [1, 1]} : vector<8x32xf32> to vector<8x8xf32>
    %133 = vector.extract_strided_slice %130 {offsets = [0, 16], sizes = [8, 8], strides = [1, 1]} : vector<8x32xf32> to vector<8x8xf32>
    %134 = vector.extract_strided_slice %130 {offsets = [0, 24], sizes = [8, 8], strides = [1, 1]} : vector<8x32xf32> to vector<8x8xf32>
    %135 = vector.shape_cast %131 : vector<8x8xf32> to vector<1x8x8xf32>
    %136 = vector.shape_cast %132 : vector<8x8xf32> to vector<1x8x8xf32>
    %137 = vector.shape_cast %133 : vector<8x8xf32> to vector<1x8x8xf32>
    %138 = vector.shape_cast %134 : vector<8x8xf32> to vector<1x8x8xf32>
    %139 = tpu.concatenate %135, %136, %137, %138 in 0 : vector<1x8x8xf32>, vector<1x8x8xf32>, vector<1x8x8xf32>, vector<1x8x8xf32> -> vector<4x8x8xf32>
    %c0_34 = arith.constant 0 : index
    %c0_35 = arith.constant 0 : index
    %c0_36 = arith.constant 0 : index
    %140 = vector.load %arg5[%c0_34, %c0_35, %c0_36] : memref<1x1x8xf32, #tpu.memory_space<vmem>>, vector<1x1x8xf32>
    %141 = vector.shape_cast %140 : vector<1x1x8xf32> to vector<1x8xf32>
    %cst_37 = arith.constant 0.353553385 : f32
    %142 = vector.broadcast %cst_37 : f32 to vector<1x8xf32>
    %143 = arith.mulf %141, %142 : vector<1x8xf32>
    %cst_38 = arith.constant dense<0.000000e+00> : vector<4x8xf32>
    %144 = vector.multi_reduction <add>, %139, %cst_38 [2] : vector<4x8x8xf32> to vector<4x8xf32>
    %145 = vector.shape_cast %144 : vector<4x8xf32> to vector<4x8x1xf32>
    %cst_39 = arith.constant 8.000000e+00 : f32
    %146 = vector.broadcast %cst_39 : f32 to vector<4x8x1xf32>
    %147 = arith.divf %145, %146 : vector<4x8x1xf32>
    %148 = vector.broadcast %147 : vector<4x8x1xf32> to vector<4x8x8xf32>
    %149 = arith.subf %139, %148 : vector<4x8x8xf32>
    %150 = arith.mulf %149, %149 : vector<4x8x8xf32>
    %cst_40 = arith.constant dense<0.000000e+00> : vector<4x8xf32>
    %151 = vector.multi_reduction <add>, %150, %cst_40 [2] : vector<4x8x8xf32> to vector<4x8xf32>
    %152 = vector.shape_cast %151 : vector<4x8xf32> to vector<4x8x1xf32>
    %cst_41 = arith.constant 8.000000e+00 : f32
    %153 = vector.broadcast %cst_41 : f32 to vector<4x8x1xf32>
    %154 = arith.divf %152, %153 : vector<4x8x1xf32>
    %cst_42 = arith.constant 9.99999974E-6 : f32
    %155 = vector.broadcast %cst_42 : f32 to vector<4x8x1xf32>
    %156 = arith.addf %154, %155 : vector<4x8x1xf32>
    %157 = math.rsqrt %156 : vector<4x8x1xf32>
    %158 = vector.broadcast %157 : vector<4x8x1xf32> to vector<4x8x8xf32>
    %159 = arith.mulf %149, %158 : vector<4x8x8xf32>
    %160 = vector.shape_cast %143 : vector<1x8xf32> to vector<1x1x8xf32>
    %161 = vector.broadcast %160 : vector<1x1x8xf32> to vector<4x8x8xf32>
    %162 = arith.mulf %159, %161 : vector<4x8x8xf32>
    %163 = vector.extract_strided_slice %29 {offsets = [8, 0], sizes = [8, 32], strides = [1, 1]} : vector<16x32xf32> to vector<8x32xf32>
    %164 = vector.extract_strided_slice %163 {offsets = [0, 0], sizes = [8, 8], strides = [1, 1]} : vector<8x32xf32> to vector<8x8xf32>
    %165 = vector.extract_strided_slice %163 {offsets = [0, 8], sizes = [8, 8], strides = [1, 1]} : vector<8x32xf32> to vector<8x8xf32>
    %166 = vector.extract_strided_slice %163 {offsets = [0, 16], sizes = [8, 8], strides = [1, 1]} : vector<8x32xf32> to vector<8x8xf32>
    %167 = vector.extract_strided_slice %163 {offsets = [0, 24], sizes = [8, 8], strides = [1, 1]} : vector<8x32xf32> to vector<8x8xf32>
    %168 = vector.shape_cast %164 : vector<8x8xf32> to vector<1x8x8xf32>
    %169 = vector.shape_cast %165 : vector<8x8xf32> to vector<1x8x8xf32>
    %170 = vector.shape_cast %166 : vector<8x8xf32> to vector<1x8x8xf32>
    %171 = vector.shape_cast %167 : vector<8x8xf32> to vector<1x8x8xf32>
    %172 = tpu.concatenate %168, %169, %170, %171 in 0 : vector<1x8x8xf32>, vector<1x8x8xf32>, vector<1x8x8xf32>, vector<1x8x8xf32> -> vector<4x8x8xf32>
    %c0_43 = arith.constant 0 : index
    %c0_44 = arith.constant 0 : index
    %c0_45 = arith.constant 0 : index
    %173 = vector.load %arg6[%c0_43, %c0_44, %c0_45] : memref<1x1x8xf32, #tpu.memory_space<vmem>>, vector<1x1x8xf32>
    %174 = vector.shape_cast %173 : vector<1x1x8xf32> to vector<1x8xf32>
    %cst_46 = arith.constant dense<0.000000e+00> : vector<4x8xf32>
    %175 = vector.multi_reduction <add>, %172, %cst_46 [2] : vector<4x8x8xf32> to vector<4x8xf32>
    %176 = vector.shape_cast %175 : vector<4x8xf32> to vector<4x8x1xf32>
    %cst_47 = arith.constant 8.000000e+00 : f32
    %177 = vector.broadcast %cst_47 : f32 to vector<4x8x1xf32>
    %178 = arith.divf %176, %177 : vector<4x8x1xf32>
    %179 = vector.broadcast %178 : vector<4x8x1xf32> to vector<4x8x8xf32>
    %180 = arith.subf %172, %179 : vector<4x8x8xf32>
    %181 = arith.mulf %180, %180 : vector<4x8x8xf32>
    %cst_48 = arith.constant dense<0.000000e+00> : vector<4x8xf32>
    %182 = vector.multi_reduction <add>, %181, %cst_48 [2] : vector<4x8x8xf32> to vector<4x8xf32>
    %183 = vector.shape_cast %182 : vector<4x8xf32> to vector<4x8x1xf32>
    %cst_49 = arith.constant 8.000000e+00 : f32
    %184 = vector.broadcast %cst_49 : f32 to vector<4x8x1xf32>
    %185 = arith.divf %183, %184 : vector<4x8x1xf32>
    %cst_50 = arith.constant 9.99999974E-6 : f32
    %186 = vector.broadcast %cst_50 : f32 to vector<4x8x1xf32>
    %187 = arith.addf %185, %186 : vector<4x8x1xf32>
    %188 = math.rsqrt %187 : vector<4x8x1xf32>
    %189 = vector.broadcast %188 : vector<4x8x1xf32> to vector<4x8x8xf32>
    %190 = arith.mulf %180, %189 : vector<4x8x8xf32>
    %191 = vector.shape_cast %174 : vector<1x8xf32> to vector<1x1x8xf32>
    %192 = vector.broadcast %191 : vector<1x1x8xf32> to vector<4x8x8xf32>
    %193 = arith.mulf %190, %192 : vector<4x8x8xf32>
    %194 = vector.extract_strided_slice %30 {offsets = [8, 0], sizes = [8, 32], strides = [1, 1]} : vector<16x32xf32> to vector<8x32xf32>
    %195 = vector.extract_strided_slice %194 {offsets = [0, 0], sizes = [8, 8], strides = [1, 1]} : vector<8x32xf32> to vector<8x8xf32>
    %196 = vector.extract_strided_slice %194 {offsets = [0, 8], sizes = [8, 8], strides = [1, 1]} : vector<8x32xf32> to vector<8x8xf32>
    %197 = vector.extract_strided_slice %194 {offsets = [0, 16], sizes = [8, 8], strides = [1, 1]} : vector<8x32xf32> to vector<8x8xf32>
    %198 = vector.extract_strided_slice %194 {offsets = [0, 24], sizes = [8, 8], strides = [1, 1]} : vector<8x32xf32> to vector<8x8xf32>
    %199 = vector.shape_cast %195 : vector<8x8xf32> to vector<1x8x8xf32>
    %200 = vector.shape_cast %196 : vector<8x8xf32> to vector<1x8x8xf32>
    %201 = vector.shape_cast %197 : vector<8x8xf32> to vector<1x8x8xf32>
    %202 = vector.shape_cast %198 : vector<8x8xf32> to vector<1x8x8xf32>
    %203 = tpu.concatenate %199, %200, %201, %202 in 0 : vector<1x8x8xf32>, vector<1x8x8xf32>, vector<1x8x8xf32>, vector<1x8x8xf32> -> vector<4x8x8xf32>
    %204 = arith.truncf %162 : vector<4x8x8xf32> to vector<4x8x8xbf16>
    %205 = arith.truncf %193 : vector<4x8x8xf32> to vector<4x8x8xbf16>
    "tpu.trace_start"() <{level = 10 : i32, message = "hqd,hkd->hqk"}> : () -> ()
    %cst_51 = arith.constant dense<0.000000e+00> : vector<4x8x8xf32>
    %206 = tpu.matmul %204, %205, %cst_51 {dimension_numbers = #tpu.dot_dimension_numbers<[2], [2], [1], [1], [0, 0, 0, 1, 1, 1], [0], [0]>} : vector<4x8x8xbf16>, vector<4x8x8xbf16>, vector<4x8x8xf32> -> vector<4x8x8xf32>
    "tpu.trace_stop"() : () -> ()
    %cst_52 = arith.constant dense<0xFF800000> : vector<4x8xf32>
    %207 = vector.multi_reduction <maximumf>, %206, %cst_52 [2] : vector<4x8x8xf32> to vector<4x8xf32>
    %208 = vector.shape_cast %207 : vector<4x8xf32> to vector<4x8x1xf32>
    %209 = vector.broadcast %208 : vector<4x8x1xf32> to vector<4x8x8xf32>
    %210 = arith.subf %206, %209 : vector<4x8x8xf32>
    %211 = math.exp %210 : vector<4x8x8xf32>
    %cst_53 = arith.constant dense<0.000000e+00> : vector<4x8xf32>
    %212 = vector.multi_reduction <add>, %211, %cst_53 [2] : vector<4x8x8xf32> to vector<4x8xf32>
    %213 = vector.shape_cast %212 : vector<4x8xf32> to vector<4x8x1xf32>
    %214 = tpu.reciprocal %213 {approx = true} : vector<4x8x1xf32> -> vector<4x8x1xf32>
    %215 = vector.broadcast %214 : vector<4x8x1xf32> to vector<4x8x8xf32>
    %216 = arith.mulf %211, %215 : vector<4x8x8xf32>
    %217 = arith.truncf %216 : vector<4x8x8xf32> to vector<4x8x8xbf16>
    %218 = arith.truncf %203 : vector<4x8x8xf32> to vector<4x8x8xbf16>
    "tpu.trace_start"() <{level = 10 : i32, message = "hqk,hkd->hqd"}> : () -> ()
    %cst_54 = arith.constant dense<0.000000e+00> : vector<4x8x8xf32>
    %219 = tpu.matmul %217, %218, %cst_54 {dimension_numbers = #tpu.dot_dimension_numbers<[2], [1], [1], [2], [0, 0, 0, 1, 1, 2], [0], [0]>} : vector<4x8x8xbf16>, vector<4x8x8xbf16>, vector<4x8x8xf32> -> vector<4x8x8xf32>
    "tpu.trace_stop"() : () -> ()
    %220 = vector.extract_strided_slice %219 {offsets = [0, 0, 0], sizes = [1, 8, 8], strides = [1, 1, 1]} : vector<4x8x8xf32> to vector<1x8x8xf32>
    %221 = vector.shape_cast %220 : vector<1x8x8xf32> to vector<8x8xf32>
    %222 = vector.extract_strided_slice %219 {offsets = [1, 0, 0], sizes = [1, 8, 8], strides = [1, 1, 1]} : vector<4x8x8xf32> to vector<1x8x8xf32>
    %223 = vector.shape_cast %222 : vector<1x8x8xf32> to vector<8x8xf32>
    %224 = vector.extract_strided_slice %219 {offsets = [2, 0, 0], sizes = [1, 8, 8], strides = [1, 1, 1]} : vector<4x8x8xf32> to vector<1x8x8xf32>
    %225 = vector.shape_cast %224 : vector<1x8x8xf32> to vector<8x8xf32>
    %226 = vector.extract_strided_slice %219 {offsets = [3, 0, 0], sizes = [1, 8, 8], strides = [1, 1, 1]} : vector<4x8x8xf32> to vector<1x8x8xf32>
    %227 = vector.shape_cast %226 : vector<1x8x8xf32> to vector<8x8xf32>
    %228 = tpu.concatenate %221, %223, %225, %227 in 1 : vector<8x8xf32>, vector<8x8xf32>, vector<8x8xf32>, vector<8x8xf32> -> vector<8x32xf32>
    %229 = tpu.concatenate %129, %228 in 0 : vector<8x32xf32>, vector<8x32xf32> -> vector<16x32xf32>
    %230 = arith.truncf %229 : vector<16x32xf32> to vector<16x32xbf16>
    %c0_55 = arith.constant 0 : index
    %c0_56 = arith.constant 0 : index
    %c0_57 = arith.constant 0 : index
    %231 = vector.load %arg7[%c0_55, %c0_56, %c0_57] : memref<1x32x32xbf16, #tpu.memory_space<vmem>>, vector<1x32x32xbf16>
    %232 = vector.shape_cast %231 : vector<1x32x32xbf16> to vector<32x32xbf16>
    %cst_58 = arith.constant dense<0.000000e+00> : vector<16x32xf32>
    %233 = tpu.matmul %230, %232, %cst_58 {dimension_numbers = #tpu.dot_dimension_numbers<[1], [0], [0], [1], [0, 0, 1, 1], [], []>} : vector<16x32xbf16>, vector<32x32xbf16>, vector<16x32xf32> -> vector<16x32xf32>
    %234 = arith.addf %3, %233 : vector<16x32xf32>
    %c0_59 = arith.constant 0 : index
    %c0_60 = arith.constant 0 : index
    %c0_61 = arith.constant 0 : index
    %235 = vector.load %arg8[%c0_59, %c0_60, %c0_61] : memref<1x1x32xf32, #tpu.memory_space<vmem>>, vector<1x1x32xf32>
    %236 = vector.shape_cast %235 : vector<1x1x32xf32> to vector<1x32xf32>
    %cst_62 = arith.constant dense<0.000000e+00> : vector<16xf32>
    %237 = vector.multi_reduction <add>, %234, %cst_62 [1] : vector<16x32xf32> to vector<16xf32>
    %238 = vector.shape_cast %237 : vector<16xf32> to vector<16x1xf32>
    %cst_63 = arith.constant 3.200000e+01 : f32
    %239 = vector.broadcast %cst_63 : f32 to vector<16x1xf32>
    %240 = arith.divf %238, %239 : vector<16x1xf32>
    %241 = vector.broadcast %240 : vector<16x1xf32> to vector<16x32xf32>
    %242 = arith.subf %234, %241 : vector<16x32xf32>
    %243 = arith.mulf %242, %242 : vector<16x32xf32>
    %cst_64 = arith.constant dense<0.000000e+00> : vector<16xf32>
    %244 = vector.multi_reduction <add>, %243, %cst_64 [1] : vector<16x32xf32> to vector<16xf32>
    %245 = vector.shape_cast %244 : vector<16xf32> to vector<16x1xf32>
    %cst_65 = arith.constant 3.200000e+01 : f32
    %246 = vector.broadcast %cst_65 : f32 to vector<16x1xf32>
    %247 = arith.divf %245, %246 : vector<16x1xf32>
    %cst_66 = arith.constant 9.99999974E-6 : f32
    %248 = vector.broadcast %cst_66 : f32 to vector<16x1xf32>
    %249 = arith.addf %247, %248 : vector<16x1xf32>
    %250 = math.rsqrt %249 : vector<16x1xf32>
    %251 = vector.broadcast %250 : vector<16x1xf32> to vector<16x32xf32>
    %252 = arith.mulf %242, %251 : vector<16x32xf32>
    %253 = vector.broadcast %236 : vector<1x32xf32> to vector<16x32xf32>
    %254 = arith.mulf %252, %253 : vector<16x32xf32>
    %255 = arith.truncf %254 : vector<16x32xf32> to vector<16x32xbf16>
    %c0_67 = arith.constant 0 : index
    %c0_68 = arith.constant 0 : index
    %c0_69 = arith.constant 0 : index
    %256 = vector.load %arg9[%c0_67, %c0_68, %c0_69] : memref<1x32x64xbf16, #tpu.memory_space<vmem>>, vector<1x32x64xbf16>
    %257 = vector.shape_cast %256 : vector<1x32x64xbf16> to vector<32x64xbf16>
    %cst_70 = arith.constant dense<0.000000e+00> : vector<16x64xf32>
    %258 = tpu.matmul %255, %257, %cst_70 {dimension_numbers = #tpu.dot_dimension_numbers<[1], [0], [0], [1], [0, 0, 1, 1], [], []>} : vector<16x32xbf16>, vector<32x64xbf16>, vector<16x64xf32> -> vector<16x64xf32>
    %c0_71 = arith.constant 0 : index
    %c0_72 = arith.constant 0 : index
    %c0_73 = arith.constant 0 : index
    %259 = vector.load %arg10[%c0_71, %c0_72, %c0_73] : memref<1x1x64xf32, #tpu.memory_space<vmem>>, vector<1x1x64xf32>
    %260 = vector.shape_cast %259 : vector<1x1x64xf32> to vector<1x64xf32>
    %261 = vector.broadcast %260 : vector<1x64xf32> to vector<16x64xf32>
    %262 = arith.addf %258, %261 : vector<16x64xf32>
    %cst_74 = arith.constant 5.000000e-01 : f32
    %263 = vector.broadcast %cst_74 : f32 to vector<16x64xf32>
    %264 = arith.mulf %263, %262 : vector<16x64xf32>
    %cst_75 = arith.constant 4.471500e-02 : f32
    %265 = vector.broadcast %cst_75 : f32 to vector<16x64xf32>
    %266 = arith.mulf %265, %262 : vector<16x64xf32>
    %267 = arith.mulf %266, %262 : vector<16x64xf32>
    %268 = arith.mulf %267, %262 : vector<16x64xf32>
    %269 = arith.addf %262, %268 : vector<16x64xf32>
    %cst_76 = arith.constant 0.797884583 : f32
    %270 = vector.broadcast %cst_76 : f32 to vector<16x64xf32>
    %271 = arith.mulf %270, %269 : vector<16x64xf32>
    %272 = math.tanh %271 : vector<16x64xf32>
    %cst_77 = arith.constant 1.000000e+00 : f32
    %273 = vector.broadcast %cst_77 : f32 to vector<16x64xf32>
    %274 = arith.addf %273, %272 : vector<16x64xf32>
    %275 = arith.mulf %264, %274 : vector<16x64xf32>
    %276 = arith.truncf %275 : vector<16x64xf32> to vector<16x64xbf16>
    %c0_78 = arith.constant 0 : index
    %c0_79 = arith.constant 0 : index
    %c0_80 = arith.constant 0 : index
    %277 = vector.load %arg11[%c0_78, %c0_79, %c0_80] : memref<1x64x32xbf16, #tpu.memory_space<vmem>>, vector<1x64x32xbf16>
    %278 = vector.shape_cast %277 : vector<1x64x32xbf16> to vector<64x32xbf16>
    %cst_81 = arith.constant dense<0.000000e+00> : vector<16x32xf32>
    %279 = tpu.matmul %276, %278, %cst_81 {dimension_numbers = #tpu.dot_dimension_numbers<[1], [0], [0], [1], [0, 0, 1, 1], [], []>} : vector<16x64xbf16>, vector<64x32xbf16>, vector<16x32xf32> -> vector<16x32xf32>
    %c0_82 = arith.constant 0 : index
    %c0_83 = arith.constant 0 : index
    %c0_84 = arith.constant 0 : index
    %280 = vector.load %arg12[%c0_82, %c0_83, %c0_84] : memref<1x1x32xf32, #tpu.memory_space<vmem>>, vector<1x1x32xf32>
    %281 = vector.shape_cast %280 : vector<1x1x32xf32> to vector<1x32xf32>
    %282 = vector.broadcast %281 : vector<1x32xf32> to vector<16x32xf32>
    %283 = arith.addf %279, %282 : vector<16x32xf32>
    %284 = arith.addf %234, %283 : vector<16x32xf32>
    %c0_85 = arith.constant 0 : index
    %c0_86 = arith.constant 0 : index
    %285 = vector.load %arg15[%c0_85, %c0_86] : memref<16x32xf32, #tpu.memory_space<vmem>>, vector<16x32xf32>
    tpu.vector_store %arg15[%c0_85, %c0_86], %284 {strides = array<i32>} : memref<16x32xf32, #tpu.memory_space<vmem>>, vector<16x32xf32>,
    %c1_i32 = arith.constant 1 : i32
    %286 = arith.cmpi eq, %arg1, %c1_i32 : i32
    %287 = arith.extui %286 : i1 to i32
    %c0_i32_87 = arith.constant 0 : i32
    %288 = arith.cmpi ne, %287, %c0_i32_87 : i32
    scf.if %288 {
      %c0_88 = arith.constant 0 : index
      %c0_89 = arith.constant 0 : index
      %289 = vector.load %arg13[%c0_88, %c0_89] : memref<1x32xf32, #tpu.memory_space<vmem>>, vector<1x32xf32>
      %cst_90 = arith.constant dense<0.000000e+00> : vector<16xf32>
      %290 = vector.multi_reduction <add>, %284, %cst_90 [1] : vector<16x32xf32> to vector<16xf32>
      %291 = vector.shape_cast %290 : vector<16xf32> to vector<16x1xf32>
      %cst_91 = arith.constant 3.200000e+01 : f32
      %292 = vector.broadcast %cst_91 : f32 to vector<16x1xf32>
      %293 = arith.divf %291, %292 : vector<16x1xf32>
      %294 = vector.broadcast %293 : vector<16x1xf32> to vector<16x32xf32>
      %295 = arith.subf %284, %294 : vector<16x32xf32>
      %296 = arith.mulf %295, %295 : vector<16x32xf32>
      %cst_92 = arith.constant dense<0.000000e+00> : vector<16xf32>
      %297 = vector.multi_reduction <add>, %296, %cst_92 [1] : vector<16x32xf32> to vector<16xf32>
      %298 = vector.shape_cast %297 : vector<16xf32> to vector<16x1xf32>
      %cst_93 = arith.constant 3.200000e+01 : f32
      %299 = vector.broadcast %cst_93 : f32 to vector<16x1xf32>
      %300 = arith.divf %298, %299 : vector<16x1xf32>
      %cst_94 = arith.constant 9.99999974E-6 : f32
      %301 = vector.broadcast %cst_94 : f32 to vector<16x1xf32>
      %302 = arith.addf %300, %301 : vector<16x1xf32>
      %303 = math.rsqrt %302 : vector<16x1xf32>
      %304 = vector.broadcast %303 : vector<16x1xf32> to vector<16x32xf32>
      %305 = arith.mulf %295, %304 : vector<16x32xf32>
      %306 = vector.broadcast %289 : vector<1x32xf32> to vector<16x32xf32>
      %307 = arith.mulf %305, %306 : vector<16x32xf32>
      %308 = vector.shape_cast %307 : vector<16x32xf32> to vector<2x8x32xf32>
      %c0_95 = arith.constant 0 : index
      %c0_96 = arith.constant 0 : index
      %c0_97 = arith.constant 0 : index
      %309 = vector.load %arg14[%c0_95, %c0_96, %c0_97] : memref<2x8x32xf32, #tpu.memory_space<vmem>>, vector<2x8x32xf32>
      tpu.vector_store %arg14[%c0_95, %c0_96, %c0_97], %308 {strides = array<i32>} : memref<2x8x32xf32, #tpu.memory_space<vmem>>, vector<2x8x32xf32>,
    } else {
    }
    return
  }
  func.func @transform_0(%arg0: i32, %arg1: i32) -> (i32, i32, i32) {
    %c0_i32 = arith.constant 0 : i32
    %c0_i32_0 = arith.constant 0 : i32
    %c0_i32_1 = arith.constant 0 : i32
    return %arg0, %c0_i32, %c0_i32_0 : i32, i32, i32
  }
  func.func @transform_1(%arg0: i32, %arg1: i32) -> (i32, i32, i32) {
    %c0_i32 = arith.constant 0 : i32
    %c0_i32_0 = arith.constant 0 : i32
    %c0_i32_1 = arith.constant 0 : i32
    return %arg1, %c0_i32, %c0_i32_0 : i32, i32, i32
  }
  func.func @transform_2(%arg0: i32, %arg1: i32) -> (i32, i32, i32) {
    %c0_i32 = arith.constant 0 : i32
    %c0_i32_0 = arith.constant 0 : i32
    %c0_i32_1 = arith.constant 0 : i32
    return %arg1, %c0_i32, %c0_i32_0 : i32, i32, i32
  }
  func.func @transform_3(%arg0: i32, %arg1: i32) -> (i32, i32, i32) {
    %c0_i32 = arith.constant 0 : i32
    %c0_i32_0 = arith.constant 0 : i32
    %c0_i32_1 = arith.constant 0 : i32
    return %arg1, %c0_i32, %c0_i32_0 : i32, i32, i32
  }
  func.func @transform_4(%arg0: i32, %arg1: i32) -> (i32, i32, i32) {
    %c0_i32 = arith.constant 0 : i32
    %c0_i32_0 = arith.constant 0 : i32
    %c0_i32_1 = arith.constant 0 : i32
    return %arg1, %c0_i32, %c0_i32_0 : i32, i32, i32
  }
  func.func @transform_5(%arg0: i32, %arg1: i32) -> (i32, i32, i32) {
    %c0_i32 = arith.constant 0 : i32
    %c0_i32_0 = arith.constant 0 : i32
    %c0_i32_1 = arith.constant 0 : i32
    return %arg1, %c0_i32, %c0_i32_0 : i32, i32, i32
  }
  func.func @transform_6(%arg0: i32, %arg1: i32) -> (i32, i32, i32) {
    %c0_i32 = arith.constant 0 : i32
    %c0_i32_0 = arith.constant 0 : i32
    %c0_i32_1 = arith.constant 0 : i32
    return %arg1, %c0_i32, %c0_i32_0 : i32, i32, i32
  }
  func.func @transform_7(%arg0: i32, %arg1: i32) -> (i32, i32, i32) {
    %c0_i32 = arith.constant 0 : i32
    %c0_i32_0 = arith.constant 0 : i32
    %c0_i32_1 = arith.constant 0 : i32
    return %arg1, %c0_i32, %c0_i32_0 : i32, i32, i32
  }
  func.func @transform_8(%arg0: i32, %arg1: i32) -> (i32, i32, i32) {
    %c0_i32 = arith.constant 0 : i32
    %c0_i32_0 = arith.constant 0 : i32
    %c0_i32_1 = arith.constant 0 : i32
    return %arg1, %c0_i32, %c0_i32_0 : i32, i32, i32
  }
  func.func @transform_9(%arg0: i32, %arg1: i32) -> (i32, i32, i32) {
    %c0_i32 = arith.constant 0 : i32
    %c0_i32_0 = arith.constant 0 : i32
    %c0_i32_1 = arith.constant 0 : i32
    return %arg1, %c0_i32, %c0_i32_0 : i32, i32, i32
  }
  func.func @transform_10(%arg0: i32, %arg1: i32) -> (i32, i32, i32) {
    %c0_i32 = arith.constant 0 : i32
    %c0_i32_0 = arith.constant 0 : i32
    %c0_i32_1 = arith.constant 0 : i32
    return %arg1, %c0_i32, %c0_i32_0 : i32, i32, i32
  }
  func.func @transform_11(%arg0: i32, %arg1: i32) -> (i32, i32) {
    %c0_i32 = arith.constant 0 : i32
    %c0_i32_0 = arith.constant 0 : i32
    %c0_i32_1 = arith.constant 0 : i32
    return %c0_i32, %c0_i32_0 : i32, i32
  }
  func.func @transform_12(%arg0: i32, %arg1: i32) -> (i32, i32, i32) {
    %c0_i32 = arith.constant 0 : i32
    %c0_i32_0 = arith.constant 0 : i32
    %c0_i32_1 = arith.constant 0 : i32
    return %arg0, %c0_i32, %c0_i32_0 : i32, i32, i32
  }
}

</mosaic_0001>

<bundles_post_ra>
// kernel: tpu_custom_call.1
= control target key start
LH: loop header
LB: loop body
LE: loop exit
PB: predicated region body
PF: predicated region fallthrough
CT: control target
= control target key end

     0   :  { %s3602_s0 = inlined_call_operand.vmem [shape: f32[4,8,32], index: 0, kind: input, shape index: {}]   ;;  %s3603_s1 = inlined_call_operand.hbm [shape: f32[2,1,32], index: 1, kind: input, shape index: {}]   ;;  %s3604_s2 = inlined_call_operand.vmem [shape: bf16[2,32,96], index: 2, kind: input, shape index: {}]   ;;  %s3605_s3 = inlined_call_operand.hbm [shape: f32[2,1,8], index: 3, kind: input, shape index: {}]   ;;  %s3606_s4 = inlined_call_operand.vmem [shape: f32[2,1,8], index: 4, kind: input, shape index: {}]   ;;  %s3607_s5 = inlined_call_operand.vmem [shape: bf16[2,32,32], index: 5, kind: input, shape index: {}]   ;;  %s3608_s6 = inlined_call_operand.vmem [shape: f32[2,1,32], index: 6, kind: input, shape index: {}]   ;;  %s3609_s7 = inlined_call_operand.hbm [shape: bf16[2,32,64], index: 7, kind: input, shape index: {}]   ;;  %s3610_s8 = inlined_call_operand.vmem [shape: f32[2,1,64], index: 8, kind: input, shape index: {}]   ;;  %s3611_s9 = inlined_call_operand.vmem [shape: bf16[2,64,32], index: 9, kind: input, shape index: {}]   ;;  %s3612_s10 = inlined_call_operand.vmem [shape: f32[2,1,32], index: 10, kind: input, shape index: {}]   ;;  %s3613_s11 = inlined_call_operand.vmem [shape: f32[1,32], index: 11, kind: input, shape index: {}]   ;;  %s3614_s12 = inlined_call_operand.hbm [shape: f32[4,8,32], index: 12, kind: output, shape index: {}]  }
   0x1   :  { %3630 = sst [smem:[#allocation26_spill]] %s3602_s0 }
   0x2   :  { %3631 = sst [smem:[#allocation27_spill]] %s3603_s1 }
   0x3   :  { %3632 = sst [smem:[#allocation28_spill]] %s3604_s2 }
   0x4   :  { %3633 = sst [smem:[#allocation29_spill]] %s3605_s3 }
   0x5   :  { %3634 = sst [smem:[#allocation30_spill]] %s3606_s4 }
   0x6   :  { %3635 = sst [smem:[#allocation31_spill]] %s3607_s5 }
   0x7   :  { %3636 = sst [smem:[#allocation32_spill]] %s3608_s6 }
   0x8   :  { %3637 = sst [smem:[#allocation33_spill]] %s3609_s7 }
   0x9   :  { %3638 = sst [smem:[#allocation34_spill]] %s3610_s8 }
   0xa   :  { %3639 = sst [smem:[#allocation35_spill]] %s3611_s9 }
   0xb   :  { %3640 = sst [smem:[#allocation36_spill]] %s3612_s10 }
   0xc   :  { %3641 = sst [smem:[#allocation37_spill]] %s3613_s11 }
   0xd   :  { %3642 = sst [smem:[#allocation38_spill]] %s3614_s12 }
   0xe   :  { %17 = vsyncpa [#allocation4], 0 }
   0xf   :  { %19 = vsyncpa [#allocation4 + $0x1], 0 }
  0x10   :  { %20 = vsyncpa [#allocation7], 0 }
  0x11   :  { %22 = vsyncpa [#allocation7 + $0x1], 0 }
  0x12   :  { %23 = vsyncpa [#allocation5], 0 }
  0x13   :  { %25 = vsyncpa [#allocation5 + $0x1], 0  ;;  %s2874_s21 = smov 0   ;;  %s2876_s22 = smov 0  }
  0x14   :  { %s2878_s23 = smov 0   ;;  %s2880_s24 = smov 0  }
  0x15   :  { %s2882_s25 = smov 0   ;;  %s2884_s26 = smov 0  }
  0x16   :  { %s2886_s27 = smov 0   ;;  %s2888_s28 = smov 0  }
  0x17   :  { %s2890_s29 = smov 0   ;;  %s2892_s30 = smov 0  }
  0x18   :  { %s2894_s13 = smov 0  }
  0x19 LB: > { %3643 = sst [smem:[#allocation13_spill]] %s2753_s21  ;;  %s2928_s14 = sadd.s32 4294967295, %s2793_s13   ;;  %s2793_s13 = sphi %s2894_s13, %s31_s13   ;;  %s2789_s30 = sphi %s2892_s30, %s3694_s30   ;;  %s2785_s29 = sphi %s2890_s29, %s3693_s29   ;;  %s2781_s28 = sphi %s2888_s28, %s3692_s28   ;;  %s2777_s27 = sphi %s2886_s27, %s3691_s27   ;;  %s2773_s26 = sphi %s2884_s26, %s3690_s26   ;;  %s2769_s25 = sphi %s2882_s25, %s3689_s25   ;;  %s2765_s24 = sphi %s2880_s24, %s3688_s24   ;;  %s2761_s23 = sphi %s2878_s23, %s3687_s23   ;;  %s2757_s22 = sphi %s2876_s22, %s3696_s22   ;;  %s2753_s21 = sphi %s2874_s21, %s3695_s21  }
  0x1a   : > { %3644 = sst [smem:[#allocation14_spill]] %s2761_s23  ;;  %s2244_s15 = sadd.s32 4294967294, %s2793_s13  }
  0x1b   : > { %3645 = sst [smem:[#allocation15_spill]] %s2769_s25  ;;  %s40_s16 = sadd.s32 1, %s2785_s29 }
  0x1c   : > { %3646 = sst [smem:[#allocation16_spill]] %s2773_s26  ;;  %s43_s17 = sadd.s32 1, %s2789_s30 }
  0x1d   : > { %3647 = sst [smem:[#allocation17_spill]] %s2785_s29  ;;  %p41_p0 = scmp.ge.s32.totalorder %s40_s16, 2 }
  0x1e   : > { %3648 = sst [smem:[#allocation18_spill]] %s2789_s30  ;;  %s76_s18 = sadd.s32 1, %s2773_s26 }
  0x1f   : > { %3649 = sst [smem:[#allocation19_spill]] %s2793_s13  ;;  %p83_p1 = scmp.ne.s32.totalorder %s2773_s26, %s2769_s25 }
  0x20   : > { %p84_p2 = scmp.eq.s32.totalorder %s2793_s13, 0  ;;  %s3698_s16 = smov (%p41_p0, %s40_s16), 0 }
  0x21   : > { %3650 = sst [smem:[#allocation20_spill]] %s3698_s16  ;;  %s3700_s17 = smov (!%p41_p0, %s43_s17), %s2789_s30 }
  0x22   : > { %s73_s19 = ssub.s32 %s2785_s29, %s3698_s16  ;;  %p2942_p3 = por %p84_p2, %p83_p1 }
  0x23   : > { %p45_p4 = scmp.ge.s32.totalorder %s3700_s17, 2  ;;  %p74_p5 = scmp.eq.s32.totalorder %s73_s19, 0 }
  0x24   : > { %p89_p6 = scmp.ne.s32.totalorder %s2769_s25, %s2765_s24  ;;  %p90_p7 = scmp.eq.s32.totalorder %s2928_s14, 0 }
  0x25   : > { %s3702_s17 = smov (%p45_p4, %s3700_s17), 0  ;;  %s357_s10 = sadd.s32 1, %s2761_s23 }
  0x26   : > { %3652 = sst [smem:[#allocation21_spill]] %s3702_s17  ;;  %p2953_p8 = por %p90_p7, %p89_p6 }
  0x27   : > { %s2951_s12 = scalar_select %p74_p5, %s2773_s26, %s76_s18  }
  0x28   : > { %s354_s11 = ssub.s32 %s2789_s30, %s3702_s17  ;;  %p367_p10 = scmp.ne.s32.totalorder %s2761_s23, %s2757_s22 }
  0x29   : > { %3653 = sst [smem:[#allocation22_spill]] %s2951_s12  ;;  %p355_p9 = scmp.eq.s32.totalorder %s354_s11, 0 }
  0x2a   : > { %p368_p11 = scmp.eq.s32.totalorder %s2928_s14, 3  ;;  %p373_p13 = scmp.ne.s32.totalorder %s2757_s22, %s2753_s21 }
  0x2b   : > { %s2964_s19 = scalar_select %p355_p9, %s2761_s23, %s357_s10  }
  0x2c   : > { %p2966_p12 = por %p368_p11, %p367_p10  ;;  %p374_p0 = scmp.eq.s32.totalorder %s2244_s15, 3 }
  0x2d   : > { %3655 = sst [smem:[#allocation23_spill]] %s2964_s19  ;;  %p2365_p1 = scmp.lt.s32.totalorder %s2793_s13, 4 }
  0x2e   : > { %s3656_s24 = scalar_select %p2966_p12, 1, 0 }
  0x2f   : > { %s406_s18 = sand.u32 1, %s2773_s26   ;;  %p2974_p2 = por %p374_p0, %p373_p13 }
  0x30   : > { %3657 = sst [smem:[#allocation24_spill]] %s3656_s24  ;;  %s431_s11 = sand.u32 1, %s2793_s13  }
  0x31   : > { %s3658_s12 = scalar_select %p2974_p2, 1, 0 }
  0x32   : > { %p2981_p4 = pnand %p2365_p1, %p2942_p3  ;;  %s3661_s3 = sld [smem:[#allocation29_spill]] }
  0x33   : > { %3659 = sst [smem:[#allocation25_spill]] %s3658_s12  ;;  %s434_s23 = scalar_lea.vmem [#allocation6], %s406_s18 }
  0x34   : > { %s441_s26 = sshll.u32 %s434_s23, 4  ;;  %s2247_s21 = sshll.u32 %s406_s18, 4  ;;  %s442_s26 = int_to_ptr.vmem [resolvable:$true] %s441_s26 }
  0x35   : > { %s432_s12 = scalar_lea.sflag [#allocation7], %s431_s11  ;;  %p2250_p3 = scmp.ge.s32.totalorder %s2793_s13, 1 }
  0x36   : > { %p508_p5 = scmp.lt.s32.totalorder %s2793_s13, 5  ;;  %s3663_s1 = sld [smem:[#allocation27_spill]] }
  0x37   : > { %s409_s24 = scalar_lea.vmem [#allocation3], %s406_s18  ;;  %s407_s9 = scalar_lea.sflag [#allocation4], %s406_s18 }
  0x38   : > { %s437_s19 = scalar_lea.hbm %s3661_s3, %s2785_s29  ;;  %p2993_p6 = pnand %p2250_p3, %p508_p5 }
  0x39   : > { %s439_s15 = sshll.u32 %s437_s19, 4  ;;  %s416_s23 = sshll.u32 %s409_s24, 4  ;;  %s440_s15 = int_to_ptr.hbm [resolvable:$true] %s439_s15  ;;  %s417_s23 = int_to_ptr.vmem [resolvable:$true] %s416_s23 }
  0x3a   : > { %2357 = dma.hbm_to_vmem [thread:$0]  (!%p2981_p4), %s440_s15, 16, %s442_s26, %s432_s12  }
  0x3b   : > { %s2328_s26 = sshll.u32 %s2785_s29, 4  ;;  %s3664_s7 = sld [smem:[#allocation33_spill]] }
  0x3c   : > { %s412_s19 = scalar_lea.hbm %s3663_s1, %s2785_s29  ;;  %s472_s8 = scalar_lea.vmem [#allocation8], %s2247_s21 }
  0x3d   : > { %s414_s3 = sshll.u32 %s412_s19, 4  ;;  %s480_s6 = sshll.u32 %s472_s8, 4  ;;  %s415_s3 = int_to_ptr.hbm [resolvable:$true] %s414_s3  ;;  %s481_s6 = int_to_ptr.vmem [resolvable:$true] %s480_s6 }
  0x3e   : > { %2354 = dma.hbm_to_vmem [thread:$0]  (!%p2981_p4), %s415_s3, 16, %s417_s23, %s407_s9  }
  0x3f   : > { %s2795_s30 = smov 64   ;;  %s2796_s17 = smov 4  }
  0x40   : > { %512 = sbr.rel (%p2993_p6) target bundleno = 3633 (0xe31), region = 68  ;;  %s3012_s3 = sand.u32 (!%p2993_p6), 1, %s2769_s25  }
  0x41   : > { %s477_s13 = scalar_lea.hbm %s3664_s7, %s2328_s26  ;;  %s515_s9 = scalar_lea.sflag (!%p2993_p6), [#allocation4], %s3012_s3 }
  0x42   : > { %s478_s5 = sshll.u32 %s477_s13, 4  ;;  %s479_s5 = int_to_ptr.hbm [resolvable:$true] %s478_s5 }
  0x43   : > { %2360 = dma.hbm_to_vmem [thread:$0]  (!%p2981_p4), %s479_s5, 256, %s481_s6, %s432_s12, %s2795_s30, %s2795_s30, %s2796_s17  }
  0x45   : > { %2740 = dma.done.wait (%p2953_p8), %s515_s9, 16  }
  0x46   : > { %2742 = vsyncadd (%p2953_p8), %s515_s9, 4294967280  ;;  %s523_s5 = sand.u32 1, %s2928_s14  }
  0x47   : > { %s524_s6 = scalar_lea.sflag [#allocation7], %s523_s5 }
  0x48   : > { %2744 = dma.done.wait (%p2953_p8), %s524_s6, 272  }
  0x49   : > { %2746 = vsyncadd (%p2953_p8), %s524_s6, 4294967024  ;;  %s2251_s12 = sshll.u32 %s3012_s3, 4  ;;  %s3627_s21 = sand.u32 1, %s2757_s22  }
  0x4a   : > { %s2252_s13 = sshll.u32 %s3627_s21, 4  ;;  %s2253_s18 = sshll.u32 %s2781_s28, 1 }
  0x4b   : > { %p619_p7 = scmp.lt.s32.totalorder %s2253_s18, 3  ;;  %p624_p9 = scmp.lt.s32.totalorder %s2777_s27, 1 }
  0x4c   : > { %s3665_s0 = sld [smem:[#allocation26_spill]]  ;;  %p2261_p8 = scmp.ne.s32.totalorder %s2777_s27, 0 }
  0x4d   : > { %s3704_s18 = smov (!%p619_p7, %s2253_s18), 3  ;;  %s3666_s2 = sld [smem:[#allocation28_spill]] }
  0x4e   : > { %s3033_s14 = scalar_select %p624_p9, %s2777_s27, 1 }
  0x4f   : > { %s2254_s16 = sshll.u32 %s3704_s18, 3  ;;  %s3667_s4 = sld [smem:[#allocation30_spill]] }
  0x50   : > { %s2329_s23 = sshll.u32 %s3033_s14, 4  ;;  %s3668_s21 = sld [smem:[#allocation31_spill]] }
  0x51   : > { %s3669_s10 = sld [smem:[#allocation32_spill]]  ;;  %s2331_s11 = sshll.u32 %s3033_s14, 5 }
  0x52   : > { %s622_s19 = scalar_lea.vmem %s3665_s0, %s2254_s16  ;;  %s3670_s1 = sld [smem:[#allocation34_spill]] }
  0x53   : > { %s3042_s15 = scalar_lea.vmem %s3666_s2, %s2329_s23  ;;  %s3671_s29 = sld [smem:[#allocation35_spill]] }
  0x54   : > { %s3672_s25 = sld [smem:[#allocation36_spill]] }
  0x55   : > { %s3048_s9 = scalar_lea.vmem %s3667_s4, %s3033_s14 }
  0x56   : > { %s3053_s8 = scalar_lea.vmem %s3668_s21, %s2329_s23  ;;  %s3073_s21 = scalar_lea.vmem [#allocation8], %s2251_s12 }
  0x57   : > { %s639_s16 = scalar_lea.vmem %s3669_s10, %s3033_s14  ;;  %s3075_s23 = scalar_lea.vmem [#allocation9], %s2252_s13 }
  0x58   : > { %s642_s26 = scalar_lea.vmem %s3670_s1, %s3033_s14  ;;  %656 = sbr.rel (%p2261_p8) target bundleno = 96 (0x60), region = 84 }
  0x59   : > { %s3067_s30 = scalar_lea.vmem %s3671_s29, %s2331_s11 }
  0x5a   : > { %s650_s5 = scalar_lea.vmem %s3672_s25, %s3033_s14 }
  0x5d   : > { %v657_v0 = vld [vmem:[%s622_s19] sm:$0xff]  ;;  %vm659_vm0 = vcmask 261120   ;;  %v658_v1 = vld [vmem:[%s622_s19 + $0x8] sm:$0xff] }
  0x5e   : > { %660 = vst.msk [vmem:[#allocation2] sm:$0xff] %vm659_vm0, %v657_v0 }
  0x5f   : > { %661 = vst.msk [vmem:[#allocation2 + $0x8] sm:$0xff] %vm659_vm0, %v658_v1 }
  0x60 PF: > { %vm665_vm1 = vcmask 261120   ;;  %v2797_v6 = vmov 32.0   ;;  %v2333_v23 = vld [vmem:[%s3042_s15 + $0x8] sm:$0xff]  ;;  %v2332_v24 = vld [vmem:[%s3042_s15] sm:$0xff]  ;;  %s3673_s0 = scalar_lea.vmem [#allocation3], %s3012_s3  ;;  %s2798_s1 = smov 104  }
  0x61   : > { %2490 = vrcp.f32 %v2797_v6  ;;  %748 = vmatpush.bf16.msra.mxu0 %v2333_v23  ;;  %v2484_v45 = vld [vmem:[%s3673_s0] ss:$0 sm:$0xff]  ;;  %s2799_s2 = smov 120   ;;  %s2800_s4 = smov 112   ;;  %vm768_vm9 = vcmask 64512   ;;  %v2802_v0 = vmov 8.0  }
  0x62   : > { %s2801_s7 = smov 96   ;;  %s2803_s25 = smov 32  }
  0x63   : > { %s3674_s29 = scalar_lea.vmem [#allocation6], %s3012_s3  ;;  %s2804_s24 = smov 64  }
  0x64   : > { %s3675_s12 = smov %s3674_s29  ;;  %s2805_s3 = smov 16  }
  0x65   : > { %v662_v2 = vld [vmem:[#allocation2] sm:$0xff]  ;;  %749 = vmatpush.bf16.msra.mxu0 %v2332_v24  ;;  %s2806_s13 = smov 8   ;;  %s2807_s19 = smov 24  }
  0x66   : > { %v666_v3 = vsel %vm665_vm1, %v662_v2, 0.0  ;;  %v663_v4 = vld [vmem:[#allocation2 + $0x8] sm:$0xff]  ;;  %p2322_p10 = scmp.ne.s32.totalorder %s2777_s27, 1 }
  0x67   : > { %667 = vadd.xlane.f32.xlu0 %v666_v3  ;;  %v669_v5 = vsel %vm665_vm1, %v663_v4, 0.0  ;;  %v2491_v7 = vpop.eup %2490  ;;  %s3679_s11 = sld [smem:[#allocation37_spill]] (!%p2322_p10) }
  0x68   : > { %v673_v8 = vmul.f32 32.0, %v2491_v7  ;;  %vm677_vm2 = vweird.f32 %v2491_v7 }
  0x6a   : > { %v674_v9 = vsub.f32 1.0, %v673_v8 }
  0x6c   : > { %v675_v10 = vmul.f32 %v2491_v7, %v674_v9 }
  0x6e   : > { %v676_v11 = vadd.f32 %v2491_v7, %v675_v10 }
  0x6f   : > { %670 = vadd.xlane.f32.xlu0 %v669_v5 }
  0x70   : > { %v3080_v12 = vsel %vm677_vm2, %v2491_v7, %v676_v11 }
  0xda   : > { %v668_v13 = vpop.xlane.xlu0 %667 }
  0xdb   : > { %v679_v14 = vmul.f32 %v3080_v12, %v668_v13 }
  0xdd   : > { %v681_v15 = vsub.f32 %v662_v2, %v679_v14 }
  0xdf   : > { %v683_v16 = vmul.f32 %v681_v15, %v681_v15 }
  0xe1   : > { %v685_v17 = vsel %vm665_vm1, %v683_v16, 0.0 }
  0xe2   : > { %686 = vadd.xlane.f32.xlu1 %v685_v17  ;;  %v671_v18 = vpop.xlane.xlu0 %670 }
  0xe3   : > { %v680_v19 = vmul.f32 %v3080_v12, %v671_v18 }
  0xe5   : > { %v682_v20 = vsub.f32 %v663_v4, %v680_v19 }
  0xe7   : > { %v684_v21 = vmul.f32 %v682_v20, %v682_v20 }
  0xe9   : > { %v688_v22 = vsel %vm665_vm1, %v684_v21, 0.0  ;;  %v2485_v21 = vld [vmem:[%s3048_s9] ss:$0 sm:$0xff] }
  0xea   : > { %689 = vadd.xlane.f32.xlu1 %v688_v22 }
 0x155   : > { %v687_v25 = vpop.xlane.xlu1 %686 }
 0x156   : > { %v691_v26 = vmul.f32 %v687_v25, %v3080_v12 }
 0x158   : > { %v693_v27 = vadd.f32 1e-05, %v691_v26 }
 0x15a   : > { %2492 = vrsqrt.f32 %v693_v27  ;;  %vm701_vm4 = vweird.f32 %v693_v27 }
 0x15d   : > { %v690_v28 = vpop.xlane.xlu1 %689 }
 0x15e   : > { %v692_v29 = vmul.f32 %v690_v28, %v3080_v12 }
 0x160   : > { %v2493_v30 = vpop.eup %2492  ;;  %v694_v31 = vadd.f32 1e-05, %v692_v29 }
 0x161   : > { %v696_v32 = vmul.f32 %v2493_v30, %v693_v27  ;;  %vm702_vm3 = vweird.f32 %v2493_v30 }
 0x162   : > { %2494 = vrsqrt.f32 %v694_v31  ;;  %vm703_vm5 = vmor %vm701_vm4, %vm702_vm3  ;;  %vm711_vm7 = vweird.f32 %v694_v31 }
 0x163   : > { %v697_v33 = vmul.f32 %v2493_v30, %v696_v32  ;;  %2496 = vrcp.f32 %v2802_v0 }
 0x165   : > { %v698_v34 = vmul.f32 0.5, %v697_v33 }
 0x167   : > { %v699_v35 = vsub.f32 1.5, %v698_v34 }
 0x168   : > { %v2495_v36 = vpop.eup %2494 }
 0x169   : > { %v706_v37 = vmul.f32 %v2495_v36, %v694_v31  ;;  %v700_v38 = vmul.f32 %v2493_v30, %v699_v35  ;;  %vm712_vm6 = vweird.f32 %v2495_v36  ;;  %v2497_v1 = vpop.eup %2496 }
 0x16a   : > { %vm713_vm8 = vmor %vm711_vm7, %vm712_vm6  ;;  %v782_v2 = vmul.f32 8.0, %v2497_v1  ;;  %vm786_vm10 = vweird.f32 %v2497_v1 }
 0x16b   : > { %v707_v39 = vmul.f32 %v2495_v36, %v706_v37  ;;  %v704_v41 = vsel %vm703_vm5, %v2493_v30, %v700_v38 }
 0x16c   : > { %v715_v44 = vmul.f32 %v704_v41, %v681_v15  ;;  %v783_v3 = vsub.f32 1.0, %v782_v2 }
 0x16d   : > { %v708_v40 = vmul.f32 0.5, %v707_v39 }
 0x16e   : > { %v720_v48 = vmul.f32 %v2484_v45, %v715_v44  ;;  %v784_v4 = vmul.f32 %v2497_v1, %v783_v3 }
 0x16f   : > { %v709_v42 = vsub.f32 1.5, %v708_v40 }
 0x170   : > { %v785_v5 = vadd.f32 %v2497_v1, %v784_v4 }
 0x171   : > { %v710_v43 = vmul.f32 %v2495_v36, %v709_v42 }
 0x172   : > { %v3121_v6 = vsel %vm786_vm10, %v2497_v1, %v785_v5 }
 0x173   : > { %v714_v46 = vsel %vm713_vm8, %v2495_v36, %v710_v43 }
 0x174   : > { %v716_v47 = vmul.f32 %v714_v46, %v682_v20 }
 0x176   : > { %v721_v49 = vmul.f32 %v2484_v45, %v716_v47 }
 0x178   : > { %v722_v50 = vpack.c.bf16 %v721_v49, %v720_v48 }
 0x17a   : > { %2270 = vmatmul.msk.bf16.vlgmr.msra.gmra.mxu0 %vm665_vm1, %v722_v50 }
 0x1f7   : > { %v3093_v51 = vpop.f32.mrf.mxu0 }
 0x1f8   : > { %763 = vrot.lane.b32.xlu0 %v3093_v51, %s2798_s1  ;;  %757 = vrot.lane.b32.xlu2 %v3093_v51, %s2799_s2  ;;  %v769_v27 = vsel %vm768_vm9, %v3093_v51, 0.0 }
 0x1ff   : > { %v3159_v31 = vpop.f32.mrf.mxu0 }
 0x200   : > { %760 = vrot.lane.b32.xlu2 %v3093_v51, %s2800_s4 }
 0x252   : > { %v3101_v52 = vpop.permute.xlu2 %757 }
 0x253   : > { %874 = vrot.lane.b32.xlu1 %v3101_v52, %s2801_s7  ;;  %v772_v20 = vsel %vm768_vm9, %v3101_v52, 0.0 }
 0x25a   : > { %v3105_v53 = vpop.permute.xlu2 %760 }
 0x25b   : > { %872 = vrot.lane.b32.xlu1 %v3093_v51, %s2801_s7  ;;  %876 = vrot.lane.b32.xlu2 %v3105_v53, %s2801_s7  ;;  %v775_v63 = vsel %vm768_vm9, %v3105_v53, 0.0 }
 0x26a   : > { %v3111_v54 = vpop.permute.xlu0 %763 }
 0x26b   : > { %878 = vrot.lane.b32.xlu2 %v3111_v54, %s2801_s7  ;;  %v778_v36 = vsel %vm768_vm9, %v3111_v54, 0.0 }
 0x2b5   : > { %v877_v55 = vpop.permute.xlu2 %876 }
 0x2b6   : > { %v890_v56 = vsel %vm768_vm9, %v877_v55, 0.0 }
 0x2b7   : > { %891 = vadd.xlane.f32.xlu0 %v890_v56 }
 0x2c5   : > { %v875_v57 = vpop.permute.xlu1 %874  ;;  %v879_v58 = vpop.permute.xlu2 %878 }
 0x2c6   : > { %v887_v59 = vsel %vm768_vm9, %v875_v57, 0.0  ;;  %v893_v60 = vsel %vm768_vm9, %v879_v58, 0.0 }
 0x2c7   : > { %888 = vadd.xlane.f32.xlu2 %v887_v59  ;;  %894 = vadd.xlane.f32.xlu1 %v893_v60 }
 0x2cd   : > { %v873_v61 = vpop.permute.xlu1 %872 }
 0x2ce   : > { %v884_v62 = vsel %vm768_vm9, %v873_v61, 0.0 }
 0x2cf   : > { %885 = vadd.xlane.f32.xlu1 %v884_v62 }
 0x2d7   : > { %776 = vadd.xlane.f32.xlu1 %v775_v63 }
 0x32a   : > { %v892_v7 = vpop.xlane.xlu0 %891 }
 0x32b   : > { %v898_v8 = vmul.f32 %v892_v7, %v3121_v6 }
 0x32d   : > { %v3125_v9 = vsub.f32 %v3105_v53, %v898_v8 }
 0x32f   : > { %v906_v10 = vmul.f32 %v3125_v9, %v3125_v9 }
 0x331   : > { %916 = vrot.lane.b32.xlu0 %v906_v10, %s2801_s7 }
 0x33a   : > { %v889_v11 = vpop.xlane.xlu2 %888  ;;  %v895_v14 = vpop.xlane.xlu1 %894 }
 0x33b   : > { %v897_v13 = vmul.f32 %v889_v11, %v3121_v6  ;;  %v899_v16 = vmul.f32 %v895_v14, %v3121_v6 }
 0x33d   : > { %v3132_v15 = vsub.f32 %v3101_v52, %v897_v13  ;;  %v3139_v18 = vsub.f32 %v3111_v54, %v899_v16 }
 0x33f   : > { %v905_v17 = vmul.f32 %v3132_v15, %v3132_v15  ;;  %v907_v19 = vmul.f32 %v3139_v18, %v3139_v18 }
 0x341   : > { %914 = vrot.lane.b32.xlu2 %v905_v17, %s2801_s7 }
 0x342   : > { %v886_v26 = vpop.xlane.xlu1 %885 }
 0x343   : > { %v896_v28 = vmul.f32 %v886_v26, %v3121_v6 }
 0x345   : > { %v3154_v29 = vsub.f32 %v3093_v51, %v896_v28 }
 0x347   : > { %v904_v30 = vmul.f32 %v3154_v29, %v3154_v29 }
 0x349   : > { %918 = vrot.lane.b32.xlu2 %v907_v19, %s2801_s7 }
 0x34a   : > { %v777_v33 = vpop.xlane.xlu1 %776 }
 0x34b   : > { %v790_v37 = vmul.f32 %v3121_v6, %v777_v33 }
 0x34d   : > { %v3175_v40 = vsub.f32 %v3105_v53, %v790_v37 }
 0x34f   : > { %v798_v42 = vmul.f32 %v3175_v40, %v3175_v40 }
 0x351   : > { %v806_v43 = vsel %vm768_vm9, %v798_v42, 0.0 }
 0x372   : > { %773 = vadd.xlane.f32.xlu2 %v772_v20 }
 0x38a   : > { %990 = vrot.lane.b32.xlu2 %v2485_v21, %s2803_s25 }
 0x39b   : > { %v915_v22 = vpop.permute.xlu2 %914 }
 0x39c   : > { %v927_v23 = vsel %vm768_vm9, %v915_v22, 0.0 }
 0x39d   : > { %928 = vadd.xlane.f32.xlu0 %v927_v23 }
 0x3a3   : > { %v917_v24 = vpop.permute.xlu0 %916  ;;  %v3163_v32 = vpop.permute.xlu2 %918 }
 0x3a4   : > { %v930_v25 = vsel %vm768_vm9, %v917_v24, 0.0 }
 0x3a5   : > { %931 = vadd.xlane.f32.xlu1 %v930_v25  ;;  %v933_v25 = vsel %vm768_vm9, %v3163_v32, 0.0 }
 0x3b3   : > { %770 = vadd.xlane.f32.xlu2 %v769_v27 }
 0x3be   : > { %912 = vrot.lane.b32.xlu1 %v904_v30, %s2801_s7 }
 0x3cb   : > { %1274 = vrot.lane.b32.xlu2 %v3159_v31, %s2798_s1 }
 0x3e5   : > { %v774_v34 = vpop.xlane.xlu2 %773 }
 0x3e6   : > { %v789_v35 = vmul.f32 %v3121_v6, %v774_v34 }
 0x3e8   : > { %v3170_v38 = vsub.f32 %v3101_v52, %v789_v35  ;;  %779 = vadd.xlane.f32.xlu1 %v778_v36 }
 0x3ea   : > { %v797_v39 = vmul.f32 %v3170_v38, %v3170_v38 }
 0x3ec   : > { %v803_v41 = vsel %vm768_vm9, %v797_v39, 0.0 }
 0x3ed   : > { %804 = vadd.xlane.f32.xlu0 %v803_v41  ;;  %v3182_v47 = vpop.permute.xlu2 %990 }
 0x3f5   : > { %807 = vadd.xlane.f32.xlu0 %v806_v43 }
 0x410   : > { %v929_v4 = vpop.xlane.xlu0 %928 }
 0x411   : > { %v937_v5 = vmul.f32 %v929_v4, %v3121_v6 }
 0x413   : > { %v941_v7 = vadd.f32 1e-05, %v937_v5 }
 0x415   : > { %vm960_vm15 = vweird.f32 %v941_v7 }
 0x418   : > { %v932_v44 = vpop.xlane.xlu1 %931 }
 0x419   : > { %v938_v45 = vmul.f32 %v932_v44, %v3121_v6 }
 0x41b   : > { %v942_v46 = vadd.f32 1e-05, %v938_v45 }
 0x41d   : > { %2498 = vrsqrt.f32 %v942_v46  ;;  %vm970_vm12 = vweird.f32 %v942_v46 }
 0x41e   : > { %2500 = vrsqrt.f32 %v941_v7 }
 0x423   : > { %v2499_v48 = vpop.eup %2498 }
 0x424   : > { %v965_v49 = vmul.f32 %v2499_v48, %v942_v46  ;;  %vm971_vm11 = vweird.f32 %v2499_v48  ;;  %v2501_v8 = vpop.eup %2500  ;;  %v766_v46 = vld [vmem:[%s3674_s29] sm:$0x1] }
 0x425   : > { %vm972_vm13 = vmor %vm970_vm12, %vm971_vm11  ;;  %vm961_vm14 = vweird.f32 %v2501_v8 }
 0x426   : > { %v966_v50 = vmul.f32 %v2499_v48, %v965_v49  ;;  %v771_v55 = vpop.xlane.xlu2 %770  ;;  %vm962_vm0 = vmor %vm960_vm15, %vm961_vm14  ;;  %v767_v49 = vmul.f32 0.35355338, %v766_v46 }
 0x427   : > { %v788_v16 = vmul.f32 %v3121_v6, %v771_v55 }
 0x428   : > { %v967_v56 = vmul.f32 0.5, %v966_v50 }
 0x429   : > { %v3203_v21 = vsub.f32 %v3093_v51, %v788_v16 }
 0x42a   : > { %v968_v57 = vsub.f32 1.5, %v967_v56 }
 0x42b   : > { %v796_v24 = vmul.f32 %v3203_v21, %v3203_v21 }
 0x42c   : > { %v969_v58 = vmul.f32 %v2499_v48, %v968_v57  ;;  %v3223_v57 = vperm.slane %v767_v49, 0 }
 0x42d   : > { %v800_v26 = vsel %vm768_vm9, %v796_v24, 0.0 }
 0x42e   : > { %v3184_v59 = vpop.permute.xlu2 %1274  ;;  %v973_v60 = vsel %vm972_vm13, %v2499_v48, %v969_v58 }
 0x42f   : > { %1381 = vrot.lane.b32.xlu2 %v3184_v59, %s2801_s7  ;;  %v986_v61 = vmul.f32 %v973_v60, %v3125_v9  ;;  %v955_v9 = vmul.f32 %v2501_v8, %v941_v7 }
 0x430   : > { %v913_v62 = vpop.permute.xlu1 %912 }
 0x431   : > { %v924_v63 = vsel %vm768_vm9, %v913_v62, 0.0  ;;  %v995_v0 = vmul.f32 %v3182_v47, %v986_v61  ;;  %v956_v10 = vmul.f32 %v2501_v8, %v955_v9 }
 0x432   : > { %925 = vadd.xlane.f32.xlu0 %v924_v63 }
 0x433   : > { %v1003_v1 = vpack.c.bf16 %v995_v0, %v995_v0  ;;  %v957_v14 = vmul.f32 0.5, %v956_v10 }
 0x435   : > { %v1054_v2 = vunpack.c.l.b16 %v1003_v1  ;;  %v958_v20 = vsub.f32 1.5, %v957_v14 }
 0x437   : > { %v1055_v3 = vpack.c.b16 %v1054_v2, %v1054_v2  ;;  %v959_v23 = vmul.f32 %v2501_v8, %v958_v20 }
 0x439   : > { %1056 = vrot.lane.b32.xlu1 %v1055_v3, %s2801_s7  ;;  %v963_v27 = vsel %vm962_vm0, %v2501_v8, %v959_v23 }
 0x43a   : > { %v985_v28 = vmul.f32 %v963_v27, %v3132_v15 }
 0x43c   : > { %v994_v30 = vmul.f32 %v3182_v47, %v985_v28 }
 0x43e   : > { %v1002_v34 = vpack.c.bf16 %v994_v30, %v994_v30 }
 0x440   : > { %v1030_v35 = vunpack.c.l.b16 %v1002_v34 }
 0x441   : > { %1271 = vrot.lane.b32.xlu1 %v3159_v31, %s2800_s4 }
 0x442   : > { %v1031_v36 = vpack.c.b16 %v1030_v35, %v1030_v35 }
 0x45b   : > { %v780_v11 = vpop.xlane.xlu1 %779 }
 0x45c   : > { %v791_v13 = vmul.f32 %v3121_v6, %v780_v11 }
 0x45e   : > { %v3198_v17 = vsub.f32 %v3111_v54, %v791_v13 }
 0x460   : > { %v799_v19 = vmul.f32 %v3198_v17, %v3198_v17  ;;  %v805_v33 = vpop.xlane.xlu0 %804 }
 0x461   : > { %v813_v61 = vmul.f32 %v805_v33, %v3121_v6 }
 0x462   : > { %v809_v22 = vsel %vm768_vm9, %v799_v19, 0.0 }
 0x463   : > { %810 = vadd.xlane.f32.xlu0 %v809_v22  ;;  %v817_v62 = vadd.f32 1e-05, %v813_v61 }
 0x465   : > { %vm836_vm6 = vweird.f32 %v817_v62 }
 0x468   : > { %v808_v37 = vpop.xlane.xlu0 %807 }
 0x469   : > { %v814_v39 = vmul.f32 %v808_v37, %v3121_v6 }
 0x46b   : > { %934 = vadd.xlane.f32.xlu0 %v933_v25  ;;  %801 = vadd.xlane.f32.xlu1 %v800_v26  ;;  %v818_v32 = vadd.f32 1e-05, %v814_v39 }
 0x46d   : > { %2502 = vrsqrt.f32 %v818_v32  ;;  %vm846_vm3 = vweird.f32 %v818_v32 }
 0x46e   : > { %2504 = vrsqrt.f32 %v817_v62 }
 0x473   : > { %v2503_v15 = vpop.eup %2502 }
 0x474   : > { %v841_v41 = vmul.f32 %v2503_v15, %v818_v32  ;;  %vm847_vm2 = vweird.f32 %v2503_v15 }
 0x475   : > { %vm848_vm4 = vmor %vm846_vm3, %vm847_vm2 }
 0x476   : > { %v842_v42 = vmul.f32 %v2503_v15, %v841_v41 }
 0x478   : > { %v843_v43 = vmul.f32 0.5, %v842_v42 }
 0x47a   : > { %v844_v44 = vsub.f32 1.5, %v843_v43 }
 0x47c   : > { %v845_v45 = vmul.f32 %v2503_v15, %v844_v44 }
 0x47e   : > { %v849_v48 = vsel %vm848_vm4, %v2503_v15, %v845_v45 }
 0x47f   : > { %1032 = vrot.lane.b32.xlu0 %v1031_v36, %s2801_s7  ;;  %v862_v50 = vmul.f32 %v849_v48, %v3175_v40  ;;  %v2505_v40 = vpop.eup %2504 }
 0x480   : > { %v831_v2 = vmul.f32 %v2505_v40, %v817_v62  ;;  %vm837_vm5 = vweird.f32 %v2505_v40 }
 0x481   : > { %v869_v58 = vmul.f32 %v3223_v57, %v862_v50  ;;  %vm838_vm7 = vmor %vm836_vm6, %vm837_vm5 }
 0x482   : > { %v832_v3 = vmul.f32 %v2505_v40, %v831_v2 }
 0x483   : > { %v999_v60 = vpack.c.bf16 %v869_v58, %v869_v58 }
 0x484   : > { %1375 = vrot.lane.b32.xlu1 %v3159_v31, %s2801_s7  ;;  %v833_v7 = vmul.f32 0.5, %v832_v3 }
 0x486   : > { %v834_v9 = vsub.f32 1.5, %v833_v7 }
 0x487   : > { %1268 = vrot.lane.b32.xlu0 %v3159_v31, %s2799_s2 }
 0x488   : > { %v835_v11 = vmul.f32 %v2505_v40, %v834_v9 }
 0x48a   : > { %v839_v19 = vsel %vm838_vm7, %v2505_v40, %v835_v11 }
 0x48b   : > { %v861_v20 = vmul.f32 %v839_v19, %v3170_v38  ;;  %v1382_v19 = vpop.permute.xlu2 %1381 }
 0x48d   : > { %v868_v25 = vmul.f32 %v3223_v57, %v861_v20  ;;  %v1396_v20 = vsel %vm768_vm9, %v1382_v19, 0.0 }
 0x48f   : > { %v998_v27 = vpack.c.bf16 %v868_v25, %v868_v25 }
 0x4a5   : > { %v926_v63 = vpop.xlane.xlu0 %925 }
 0x4a6   : > { %v936_v0 = vmul.f32 %v926_v63, %v3121_v6 }
 0x4a8   : > { %v940_v1 = vadd.f32 1e-05, %v936_v0 }
 0x4aa   : > { %2506 = vrsqrt.f32 %v940_v1  ;;  %vm950_vm10 = vweird.f32 %v940_v1 }
 0x4ab   : > { %v1057_v55 = vpop.permute.xlu1 %1056 }
 0x4ac   : > { %v1062_v56 = vsel %vm768_vm9, %v1057_v55, 0 }
 0x4ad   : > { %1071 = vmatpush.bf16.xpose.msra.mxu3 %v1062_v56 }
 0x4b0   : > { %v2507_v4 = vpop.eup %2506 }
 0x4b1   : > { %v945_v8 = vmul.f32 %v2507_v4, %v940_v1  ;;  %vm951_vm8 = vweird.f32 %v2507_v4 }
 0x4b2   : > { %vm952_vm11 = vmor %vm950_vm10, %vm951_vm8 }
 0x4b3   : > { %v946_v10 = vmul.f32 %v2507_v4, %v945_v8  ;;  %v3241_v34 = vpop.permute.xlu1 %1271 }
 0x4b4   : > { %2273 = vmatmul.msk.bf16.vlgmr.msra.gmra.mxu3 %vm768_vm9, %v999_v60 }
 0x4b5   : > { %v947_v13 = vmul.f32 0.5, %v946_v10 }
 0x4b7   : > { %v948_v16 = vsub.f32 1.5, %v947_v13 }
 0x4b9   : > { %v949_v22 = vmul.f32 %v2507_v4, %v948_v16 }
 0x4bb   : > { %v953_v26 = vsel %vm952_vm11, %v2507_v4, %v949_v22 }
 0x4bc   : > { %v984_v28 = vmul.f32 %v953_v26, %v3154_v29 }
 0x4be   : > { %v993_v38 = vmul.f32 %v3182_v47, %v984_v28 }
 0x4c0   : > { %v1001_v33 = vpack.c.bf16 %v993_v38, %v993_v38 }
 0x4c2   : > { %v1006_v35 = vunpack.c.l.b16 %v1001_v33 }
 0x4c4   : > { %v1007_v36 = vpack.c.b16 %v1006_v35, %v1006_v35 }
 0x4d6   : > { %v3229_v5 = vpop.xlane.xlu0 %810 }
 0x4d7   : > { %v815_v25 = vmul.f32 %v3229_v5, %v3121_v6 }
 0x4d9   : > { %v819_v26 = vadd.f32 1e-05, %v815_v25  ;;  %v1151_v25 = vpack.c.bf16 %v3105_v53, %v3105_v53 }
 0x4db   : > { %vm856_vm4 = vweird.f32 %v819_v26 }
 0x4de   : > { %v935_v14 = vpop.xlane.xlu0 %934  ;;  %v802_v15 = vpop.xlane.xlu1 %801 }
 0x4df   : > { %v939_v39 = vmul.f32 %v935_v14, %v3121_v6  ;;  %v812_v41 = vmul.f32 %v802_v15, %v3121_v6 }
 0x4e1   : > { %v943_v32 = vadd.f32 1e-05, %v939_v39  ;;  %v816_v43 = vadd.f32 1e-05, %v812_v41 }
 0x4e3   : > { %2508 = vrsqrt.f32 %v943_v32  ;;  %vm980_vm13 = vweird.f32 %v943_v32  ;;  %vm826_vm0 = vweird.f32 %v816_v43 }
 0x4e4   : > { %2510 = vrsqrt.f32 %v816_v43 }
 0x4e5   : > { %2512 = vrsqrt.f32 %v819_v26 }
 0x4e9   : > { %v2509_v42 = vpop.eup %2508 }
 0x4ea   : > { %v975_v44 = vmul.f32 %v2509_v42, %v943_v32  ;;  %v2511_v46 = vpop.eup %2510  ;;  %vm981_vm12 = vweird.f32 %v2509_v42 }
 0x4eb   : > { %v821_v49 = vmul.f32 %v2511_v46, %v816_v43  ;;  %vm982_vm14 = vmor %vm980_vm13, %vm981_vm12  ;;  %vm827_vm15 = vweird.f32 %v2511_v46  ;;  %vm1161_vm13 = vcmask 1043456  }
 0x4ec   : > { %v976_v45 = vmul.f32 %v2509_v42, %v975_v44  ;;  %vm828_vm2 = vmor %vm826_vm0, %vm827_vm15 }
 0x4ed   : > { %v822_v55 = vmul.f32 %v2511_v46, %v821_v49 }
 0x4ee   : > { %v977_v48 = vmul.f32 0.5, %v976_v45 }
 0x4ef   : > { %v823_v58 = vmul.f32 0.5, %v822_v55 }
 0x4f0   : > { %v978_v50 = vsub.f32 1.5, %v977_v48 }
 0x4f1   : > { %v1033_v23 = vpop.permute.xlu0 %1032  ;;  %v824_v63 = vsub.f32 1.5, %v823_v58 }
 0x4f2   : > { %v1038_v24 = vsel %vm768_vm9, %v1033_v23, 0  ;;  %v979_v56 = vmul.f32 %v2509_v42, %v978_v50 }
 0x4f3   : > { %1047 = vmatpush.bf16.xpose.msra.mxu2 %v1038_v24  ;;  %v825_v1 = vmul.f32 %v2511_v46, %v824_v63  ;;  %v1285_v24 = vsel %vm768_vm9, %v3241_v34, 0.0 }
 0x4f4   : > { %v983_v62 = vsel %vm982_vm14, %v2509_v42, %v979_v56 }
 0x4f5   : > { %v987_v0 = vmul.f32 %v983_v62, %v3139_v18  ;;  %v829_v7 = vsel %vm828_vm2, %v2511_v46, %v825_v1 }
 0x4f6   : > { %v860_v8 = vmul.f32 %v829_v7, %v3203_v21  ;;  %v1376_v21 = vpop.permute.xlu1 %1375  ;;  %v1288_v7 = vsel %vm768_vm9, %v3184_v59, 0.0 }
 0x4f7   : > { %v996_v2 = vmul.f32 %v3182_v47, %v987_v0  ;;  %v1387_v22 = vsel %vm768_vm9, %v1376_v21, 0.0 }
 0x4f8   : > { %v867_v13 = vmul.f32 %v3223_v57, %v860_v8 }
 0x4f9   : > { %v3235_v30 = vpop.permute.xlu0 %1268  ;;  %v1004_v4 = vpack.c.bf16 %v996_v2, %v996_v2 }
 0x4fa   : > { %2272 = vmatmul.msk.bf16.vlgmr.msra.gmra.mxu2 %vm768_vm9, %v998_v27  ;;  %1377 = vrot.lane.b32.xlu0 %v3235_v30, %s2801_s7  ;;  %v997_v47 = vpack.c.bf16 %v867_v13, %v867_v13  ;;  %v1282_v23 = vsel %vm768_vm9, %v3235_v30, 0.0  ;;  %v2513_v27 = vpop.eup %2512 }
 0x4fb   : > { %v1078_v10 = vunpack.c.l.b16 %v1004_v4  ;;  %v851_v28 = vmul.f32 %v2513_v27, %v819_v26  ;;  %vm857_vm3 = vweird.f32 %v2513_v27  ;;  %v1203_v26 = vunpack.c.l.b16 %v1151_v25 }
 0x4fc   : > { %vm858_vm5 = vmor %vm856_vm4, %vm857_vm3 }
 0x4fd   : > { %v1079_v14 = vpack.c.b16 %v1078_v10, %v1078_v10  ;;  %v852_v38 = vmul.f32 %v2513_v27, %v851_v28  ;;  %v1204_v28 = vpack.c.b16 %v1203_v26, %v1203_v26 }
 0x502   : > { %1379 = vrot.lane.b32.xlu0 %v3241_v34, %s2801_s7 }
 0x50a   : > { %1008 = vrot.lane.b32.xlu0 %v1007_v36, %s2801_s7  ;;  %v853_v36 = vmul.f32 0.5, %v852_v38 }
 0x50c   : > { %v854_v32 = vsub.f32 1.5, %v853_v36 }
 0x50e   : > { %v855_v41 = vmul.f32 %v2513_v27, %v854_v32 }
 0x510   : > { %v859_v44 = vsel %vm858_vm5, %v2513_v27, %v855_v41 }
 0x511   : > { %v863_v45 = vmul.f32 %v859_v44, %v3198_v17 }
 0x513   : > { %v870_v49 = vmul.f32 %v3223_v57, %v863_v45 }
 0x515   : > { %v1000_v50 = vpack.c.bf16 %v870_v49, %v870_v49 }
 0x537   : > { %v3246_v29 = vpop.f32.mrf.mxu3 }
 0x538   : > { %v1107_v19 = vsel %vm768_vm9, %v3246_v29, -inf }
 0x53f   : > { %v1075_v37 = vpop.f32.mrf.mxu3 }
 0x56c   : > { %v1378_v60 = vpop.permute.xlu0 %1377 }
 0x56d   : > { %v1390_v61 = vsel %vm768_vm9, %v1378_v60, 0.0 }
 0x56e   : > { %1391 = vadd.xlane.f32.xlu0 %v1390_v61 }
 0x574   : > { %v1380_v40 = vpop.permute.xlu0 %1379 }
 0x575   : > { %v1393_v3 = vsel %vm768_vm9, %v1380_v40, 0.0 }
 0x576   : > { %1394 = vadd.xlane.f32.xlu2 %v1393_v3 }
 0x57c   : > { %v1009_v9 = vpop.permute.xlu0 %1008 }
 0x57d   : > { %v3255_v11 = vpop.f32.mrf.mxu2  ;;  %v1014_v18 = vsel %vm768_vm9, %v1009_v9, 0 }
 0x57e   : > { %1023 = vmatpush.bf16.xpose.msra.mxu1 %v1014_v18  ;;  %v1104_v10 = vsel %vm768_vm9, %v3255_v11, -inf }
 0x582   : > { %1080 = vrot.lane.b32.xlu0 %v1079_v14, %s2801_s7 }
 0x585   : > { %2271 = vmatmul.msk.bf16.vlgmr.msra.gmra.mxu1 %vm768_vm9, %v997_v47  ;;  %v1051_v16 = vpop.f32.mrf.mxu2 }
 0x5ac   : > { %1397 = vadd.xlane.f32.xlu0 %v1396_v20 }
 0x5b4   : > { %1388 = vadd.xlane.f32.xlu0 %v1387_v22  ;;  %v1279_v22 = vsel %vm768_vm9, %v3159_v31, 0.0 }
 0x5bc   : > { %1283 = vadd.xlane.f32.xlu0 %v1282_v23  ;;  %v2486_v23 = vld [vmem:[%s3048_s9] ss:$0 sm:$0xff] }
 0x5c4   : > { %1286 = vadd.xlane.f32.xlu0 %v1285_v24 }
 0x5e1   : > { %v1392_v33 = vpop.xlane.xlu0 %1391 }
 0x5e2   : > { %v1400_v35 = vmul.f32 %v1392_v33, %v3121_v6 }
 0x5e4   : > { %v3271_v37 = vsub.f32 %v3235_v30, %v1400_v35 }
 0x5e6   : > { %v1408_v39 = vmul.f32 %v3271_v37, %v3271_v37 }
 0x5e8   : > { %1417 = vrot.lane.b32.xlu1 %v1408_v39, %s2801_s7 }
 0x5e9   : > { %v1395_v15 = vpop.xlane.xlu2 %1394 }
 0x5ea   : > { %v1401_v5 = vmul.f32 %v1395_v15, %v3121_v6 }
 0x5ec   : > { %v3278_v42 = vsub.f32 %v3241_v34, %v1401_v5 }
 0x5ee   : > { %v1409_v43 = vmul.f32 %v3278_v42, %v3278_v42 }
 0x5f0   : > { %1419 = vrot.lane.b32.xlu2 %v1409_v43, %s2801_s7 }
 0x5f4   : > { %v1081_v46 = vpop.permute.xlu0 %1080 }
 0x5f5   : > { %v1086_v48 = vsel %vm768_vm9, %v1081_v46, 0 }
 0x5f6   : > { %1095 = vmatpush.bf16.xpose.msrb.mxu0 %v1086_v48 }
 0x5fd   : > { %2274 = vmatmul.msk.bf16.vlgmr.msrb.gmra.mxu0 %vm768_vm9, %v1000_v50 }
 0x602   : > { %v3287_v55 = vpop.f32.mrf.mxu1 }
 0x603   : > { %v1101_v53 = vsel %vm768_vm9, %v3287_v55, -inf }
 0x60a   : > { %v1027_v56 = vpop.f32.mrf.mxu1 }
 0x61f   : > { %v1398_v58 = vpop.xlane.xlu0 %1397 }
 0x620   : > { %v1402_v60 = vmul.f32 %v1398_v58, %v3121_v6 }
 0x622   : > { %v3291_v61 = vsub.f32 %v3184_v59, %v1402_v60 }
 0x624   : > { %v1410_v17 = vmul.f32 %v3291_v61, %v3291_v61 }
 0x626   : > { %1421 = vrot.lane.b32.xlu1 %v1410_v17, %s2801_s7 }
 0x627   : > { %v1389_v62 = vpop.xlane.xlu0 %1388 }
 0x628   : > { %v1399_v57 = vmul.f32 %v1389_v62, %v3121_v6 }
 0x62a   : > { %v3298_v63 = vsub.f32 %v3159_v31, %v1399_v57 }
 0x62c   : > { %v1407_v0 = vmul.f32 %v3298_v63, %v3298_v63 }
 0x62e   : > { %1415 = vrot.lane.b32.xlu0 %v1407_v0, %s2801_s7 }
 0x62f   : > { %v1284_v1 = vpop.xlane.xlu0 %1283 }
 0x630   : > { %v1292_v3 = vmul.f32 %v1284_v1, %v3121_v6 }
 0x632   : > { %v3306_v4 = vsub.f32 %v3235_v30, %v1292_v3 }
 0x634   : > { %v1300_v18 = vmul.f32 %v3306_v4, %v3306_v4 }
 0x636   : > { %v1306_v16 = vsel %vm768_vm9, %v1300_v18, 0.0 }
 0x637   : > { %v1287_v8 = vpop.xlane.xlu0 %1286 }
 0x638   : > { %v1293_v9 = vmul.f32 %v1287_v8, %v3121_v6 }
 0x63a   : > { %v3316_v14 = vsub.f32 %v3241_v34, %v1293_v9 }
 0x63c   : > { %v1301_v20 = vmul.f32 %v3316_v14, %v3316_v14 }
 0x63e   : > { %v1309_v21 = vsel %vm768_vm9, %v1301_v20, 0.0 }
 0x64a   : > { %v1420_v40 = vpop.permute.xlu2 %1419 }
 0x64b   : > { %v1433_v2 = vsel %vm768_vm9, %v1420_v40, 0.0 }
 0x64c   : > { %1434 = vadd.xlane.f32.xlu2 %v1433_v2 }
 0x654   : > { %1289 = vadd.xlane.f32.xlu2 %v1288_v7 }
 0x658   : > { %1105 = vmax.xlane.f32.xlu0 %v1104_v10 }
 0x65a   : > { %v1418_v13 = vpop.permute.xlu1 %1417 }
 0x65b   : > { %v1430_v47 = vsel %vm768_vm9, %v1418_v13, 0.0 }
 0x65c   : > { %1431 = vadd.xlane.f32.xlu1 %v1430_v47  ;;  %1307 = vadd.xlane.f32.xlu2 %v1306_v16 }
 0x660   : > { %1108 = vmax.xlane.f32.xlu0 %v1107_v19 }
 0x664   : > { %1310 = vadd.xlane.f32.xlu2 %v1309_v21 }
 0x66c   : > { %1280 = vadd.xlane.f32.xlu2 %v1279_v22 }
 0x674   : > { %1493 = vrot.lane.b32.xlu0 %v2486_v23, %s2803_s25 }
 0x67a   : > { %v3329_v24 = vpop.f32.mrf.mxu0 }
 0x67b   : > { %v1110_v36 = vsel %vm768_vm9, %v3329_v24, -inf }
 0x682   : > { %v1099_v27 = vpop.f32.mrf.mxu0 }
 0x684   : > { %1205 = vrot.lane.b32.xlu2 %v1204_v28, %s2804_s24 }
 0x698   : > { %v1422_v38 = vpop.permute.xlu1 %1421 }
 0x699   : > { %v1436_v33 = vsel %vm768_vm9, %v1422_v38, 0.0 }
 0x69a   : > { %1437 = vadd.xlane.f32.xlu1 %v1436_v33 }
 0x6a0   : > { %v1416_v35 = vpop.permute.xlu0 %1415 }
 0x6a1   : > { %v1427_v39 = vsel %vm768_vm9, %v1416_v35, 0.0 }
 0x6a2   : > { %1111 = vmax.xlane.f32.xlu1 %v1110_v36  ;;  %1428 = vadd.xlane.f32.xlu0 %v1427_v39 }
 0x6aa   : > { %1102 = vmax.xlane.f32.xlu1 %v1101_v53 }
 0x6bf   : > { %v1435_v32 = vpop.xlane.xlu2 %1434 }
 0x6c0   : > { %v1441_v15 = vmul.f32 %v1435_v32, %v3121_v6 }
 0x6c2   : > { %v1445_v5 = vadd.f32 1e-05, %v1441_v15 }
 0x6c4   : > { %2514 = vrsqrt.f32 %v1445_v5  ;;  %vm1473_vm7 = vweird.f32 %v1445_v5 }
 0x6c7   : > { %v1290_v41 = vpop.xlane.xlu2 %1289 }
 0x6c8   : > { %v1294_v43 = vmul.f32 %v1290_v41, %v3121_v6 }
 0x6ca   : > { %v3343_v44 = vsub.f32 %v3184_v59, %v1294_v43  ;;  %v2515_v45 = vpop.eup %2514 }
 0x6cb   : > { %v1106_v46 = vpop.xlane.xlu0 %1105  ;;  %v1468_v50 = vmul.f32 %v2515_v45, %v1445_v5  ;;  %vm1474_vm6 = vweird.f32 %v2515_v45 }
 0x6cc   : > { %v1114_v48 = vsub.f32 %v3255_v11, %v1106_v46  ;;  %v1302_v49 = vmul.f32 %v3343_v44, %v3343_v44  ;;  %vm1475_vm8 = vmor %vm1473_vm7, %vm1474_vm6 }
 0x6cd   : > { %v1469_v57 = vmul.f32 %v2515_v45, %v1468_v50 }
 0x6ce   : > { %v1119_v56 = vmul.f32 1.442695, %v1114_v48  ;;  %v1312_v58 = vsel %vm768_vm9, %v1302_v49, 0.0 }
 0x6cf   : > { %v1432_v60 = vpop.xlane.xlu1 %1431  ;;  %v3349_v17 = vpop.xlane.xlu2 %1307  ;;  %1313 = vadd.xlane.f32.xlu0 %v1312_v58  ;;  %v1470_v2 = vmul.f32 0.5, %v1469_v57 }
 0x6d0   : > { %2516 = vpow2.f32 %v1119_v56  ;;  %v1440_v62 = vmul.f32 %v1432_v60, %v3121_v6 }
 0x6d1   : > { %v1471_v10 = vsub.f32 1.5, %v1470_v2 }
 0x6d2   : > { %v1444_v0 = vadd.f32 1e-05, %v1440_v62 }
 0x6d3   : > { %v1109_v1 = vpop.xlane.xlu0 %1108  ;;  %v1472_v16 = vmul.f32 %v2515_v45, %v1471_v10 }
 0x6d4   : > { %2518 = vrsqrt.f32 %v1444_v0  ;;  %v1115_v11 = vsub.f32 %v3246_v29, %v1109_v1  ;;  %vm1463_vm11 = vweird.f32 %v1444_v0 }
 0x6d5   : > { %v1476_v22 = vsel %vm1475_vm8, %v2515_v45, %v1472_v16 }
 0x6d6   : > { %v3353_v40 = vpop.eup %2516  ;;  %v1121_v3 = vmul.f32 1.442695, %v1115_v11  ;;  %v1489_v25 = vmul.f32 %v1476_v22, %v3278_v42  ;;  %v1152_v42 = vpack.c.bf16 %v3111_v54, %v3111_v54 }
 0x6d7   : > { %v3355_v7 = vpop.xlane.xlu2 %1310  ;;  %v1128_v8 = vsel %vm768_vm9, %v3353_v40, 0.0 }
 0x6d8   : > { %2520 = vpow2.f32 %v1121_v3  ;;  %1129 = vadd.xlane.f32.xlu1 %v1128_v8  ;;  %v1227_v43 = vunpack.c.l.b16 %v1152_v42 }
 0x6da   : > { %v2519_v9 = vpop.eup %2518  ;;  %v1228_v46 = vpack.c.b16 %v1227_v43, %v1227_v43 }
 0x6db   : > { %v1458_v18 = vmul.f32 %v2519_v9, %v1444_v0  ;;  %vm1464_vm10 = vweird.f32 %v2519_v9 }
 0x6dc   : > { %vm1465_vm12 = vmor %vm1463_vm11, %vm1464_vm10 }
 0x6dd   : > { %v1459_v13 = vmul.f32 %v2519_v9, %v1458_v18 }
 0x6de   : > { %v3359_v47 = vpop.eup %2520 }
 0x6df   : > { %v1460_v29 = vmul.f32 0.5, %v1459_v13  ;;  %v1281_v19 = vpop.xlane.xlu2 %1280  ;;  %v1131_v20 = vsel %vm768_vm9, %v3359_v47, 0.0 }
 0x6e0   : > { %1132 = vadd.xlane.f32.xlu1 %v1131_v20  ;;  %v1291_v49 = vmul.f32 %v1281_v19, %v3121_v6 }
 0x6e1   : > { %v1461_v21 = vsub.f32 1.5, %v1460_v29 }
 0x6e2   : > { %v3381_v56 = vsub.f32 %v3159_v31, %v1291_v49  ;;  %v1316_v49 = vmul.f32 %v3349_v17, %v3121_v6 }
 0x6e3   : > { %v1462_v23 = vmul.f32 %v2519_v9, %v1461_v21 }
 0x6e5   : > { %v1466_v26 = vsel %vm1465_vm12, %v2519_v9, %v1462_v23 }
 0x6e6   : > { %v3364_v27 = vpop.permute.xlu0 %1493  ;;  %v1488_v28 = vmul.f32 %v1466_v26, %v3271_v37  ;;  %v1150_v37 = vpack.c.bf16 %v3101_v52, %v3101_v52  ;;  %v1299_v52 = vmul.f32 %v3381_v56, %v3381_v56 }
 0x6e7   : > { %v1206_v38 = vpop.permute.xlu2 %1205  ;;  %v1498_v33 = vmul.f32 %v3364_v27, %v1489_v25 }
 0x6e8   : > { %v1211_v35 = vsel %vm1161_vm13, %v1206_v38, 0  ;;  %v1497_v36 = vmul.f32 %v3364_v27, %v1488_v28  ;;  %v1179_v45 = vunpack.c.l.b16 %v1150_v37  ;;  %v1303_v3 = vsel %vm768_vm9, %v1299_v52, 0.0 }
 0x6e9   : > { %1220 = vmatpush.bf16.msrb.mxu3 %v1211_v35  ;;  %v1506_v39 = vpack.c.bf16 %v1498_v33, %v1498_v33  ;;  %v1317_v37 = vmul.f32 %v3355_v7, %v3121_v6 }
 0x6ea   : > { %v1505_v53 = vpack.c.bf16 %v1497_v36, %v1497_v36  ;;  %v1180_v48 = vpack.c.b16 %v1179_v45, %v1179_v45 }
 0x6eb   : > { %v1557_v32 = vunpack.c.l.b16 %v1506_v39 }
 0x6ec   : > { %v1533_v15 = vunpack.c.l.b16 %v1505_v53 }
 0x6ed   : > { %v1558_v5 = vpack.c.b16 %v1557_v32, %v1557_v32 }
 0x6ee   : > { %v1534_v41 = vpack.c.b16 %v1533_v15, %v1533_v15 }
 0x6ef   : > { %1559 = vrot.lane.b32.xlu0 %v1558_v5, %s2801_s7 }
 0x6f0   : > { %1535 = vrot.lane.b32.xlu2 %v1534_v41, %s2801_s7 }
 0x6f8   : > { %1229 = vrot.lane.b32.xlu2 %v1228_v46, %s2804_s24 }
 0x6f9   : > { %1181 = vrot.lane.b32.xlu1 %v1180_v48, %s2804_s24 }
 0x70d   : > { %v1438_v50 = vpop.xlane.xlu1 %1437 }
 0x70e   : > { %v1442_v54 = vmul.f32 %v1438_v50, %v3121_v6 }
 0x710   : > { %v1446_v58 = vadd.f32 1e-05, %v1442_v54  ;;  %v1320_v54 = vadd.f32 1e-05, %v1316_v49 }
 0x712   : > { %2522 = vrsqrt.f32 %v1446_v58  ;;  %vm1483_vm15 = vweird.f32 %v1446_v58  ;;  %vm1339_vm10 = vweird.f32 %v1320_v54 }
 0x715   : > { %v1112_v60 = vpop.xlane.xlu1 %1111  ;;  %v1429_v62 = vpop.xlane.xlu0 %1428 }
 0x716   : > { %v1116_v57 = vsub.f32 %v3329_v24, %v1112_v60  ;;  %v1439_v0 = vmul.f32 %v1429_v62, %v3121_v6 }
 0x718   : > { %v2523_v1 = vpop.eup %2522  ;;  %v1123_v11 = vmul.f32 1.442695, %v1116_v57  ;;  %v1443_v2 = vadd.f32 1e-05, %v1439_v0 }
 0x719   : > { %v1478_v8 = vmul.f32 %v2523_v1, %v1446_v58  ;;  %1304 = vadd.xlane.f32.xlu0 %v1303_v3  ;;  %vm1484_vm14 = vweird.f32 %v2523_v1 }
 0x71a   : > { %2524 = vpow2.f32 %v1123_v11  ;;  %vm1485_vm0 = vmor %vm1483_vm15, %vm1484_vm14  ;;  %vm1453_vm3 = vweird.f32 %v1443_v2 }
 0x71b   : > { %v1479_v9 = vmul.f32 %v2523_v1, %v1478_v8  ;;  %2526 = vrsqrt.f32 %v1443_v2 }
 0x71d   : > { %v1480_v10 = vmul.f32 0.5, %v1479_v9  ;;  %v1103_v43 = vpop.xlane.xlu1 %1102 }
 0x71f   : > { %v1481_v18 = vsub.f32 1.5, %v1480_v10  ;;  %v1277_v10 = vld [vmem:[%s3675_s12] sm:$0x1] }
 0x720   : > { %v3388_v13 = vpop.eup %2524 }
 0x721   : > { %v2527_v16 = vpop.eup %2526  ;;  %v1482_v29 = vmul.f32 %v2523_v1, %v1481_v18  ;;  %v1134_v24 = vsel %vm768_vm9, %v3388_v13, 0.0 }
 0x722   : > { %v1448_v19 = vmul.f32 %v2527_v16, %v1443_v2  ;;  %vm1454_vm2 = vweird.f32 %v2527_v16 }
 0x723   : > { %1135 = vadd.xlane.f32.xlu1 %v1134_v24  ;;  %v1486_v20 = vsel %vm1485_vm0, %v2523_v1, %v1482_v29  ;;  %vm1455_vm4 = vmor %vm1453_vm3, %vm1454_vm2  ;;  %v1278_v24 = vmul.f32 0.35355338, %v1277_v10 }
 0x724   : > { %v1449_v21 = vmul.f32 %v2527_v16, %v1448_v19  ;;  %v1490_v22 = vmul.f32 %v1486_v20, %v3291_v61  ;;  %v1149_v61 = vpack.c.bf16 %v3093_v51, %v3093_v51 }
 0x726   : > { %v1450_v23 = vmul.f32 0.5, %v1449_v21  ;;  %v1499_v25 = vmul.f32 %v3364_v27, %v1490_v22  ;;  %v1154_v41 = vunpack.c.l.b16 %v1149_v61  ;;  %v3417_v21 = vperm.slane %v1278_v24, 0 }
 0x728   : > { %v1451_v26 = vsub.f32 1.5, %v1450_v23  ;;  %v1507_v28 = vpack.c.bf16 %v1499_v25, %v1499_v25  ;;  %v1155_v42 = vpack.c.b16 %v1154_v41, %v1154_v41 }
 0x72a   : > { %v1452_v38 = vmul.f32 %v2527_v16, %v1451_v26  ;;  %v1581_v33 = vunpack.c.l.b16 %v1507_v28 }
 0x72c   : > { %v1582_v35 = vpack.c.b16 %v1581_v33, %v1581_v33  ;;  %v1456_v36 = vsel %vm1455_vm4, %v2527_v16, %v1452_v38  ;;  %vm1265_vm4 = vcmask 195584  }
 0x72d   : > { %v1487_v39 = vmul.f32 %v1456_v36, %v3298_v63  ;;  %v1321_v63 = vadd.f32 1e-05, %v1317_v37 }
 0x72e   : > { %1583 = vrot.lane.b32.xlu2 %v1582_v35, %s2801_s7 }
 0x72f   : > { %v1496_v53 = vmul.f32 %v3364_v27, %v1487_v39  ;;  %2528 = vrsqrt.f32 %v1321_v63  ;;  %v1113_v27 = vsub.f32 %v3287_v55, %v1103_v43  ;;  %vm1349_vm6 = vweird.f32 %v1321_v63 }
 0x731   : > { %v1504_v32 = vpack.c.bf16 %v1496_v53, %v1496_v53  ;;  %v1117_v45 = vmul.f32 1.442695, %v1113_v27 }
 0x733   : > { %v1509_v15 = vunpack.c.l.b16 %v1504_v32  ;;  %2530 = vpow2.f32 %v1117_v45 }
 0x735   : > { %v1510_v5 = vpack.c.b16 %v1509_v15, %v1509_v15  ;;  %v2529_v48 = vpop.eup %2528 }
 0x736   : > { %v1344_v50 = vmul.f32 %v2529_v48, %v1321_v63  ;;  %vm1350_vm5 = vweird.f32 %v2529_v48 }
 0x737   : > { %1511 = vrot.lane.b32.xlu0 %v1510_v5, %s2801_s7  ;;  %vm1351_vm7 = vmor %vm1349_vm6, %vm1350_vm5 }
 0x738   : > { %v1345_v58 = vmul.f32 %v2529_v48, %v1344_v50 }
 0x739   : > { %v3406_v60 = vpop.eup %2530 }
 0x73a   : > { %v1346_v55 = vmul.f32 0.5, %v1345_v58  ;;  %v1125_v57 = vsel %vm768_vm9, %v3406_v60, 0.0 }
 0x73c   : > { %1156 = vrot.lane.b32.xlu1 %v1155_v42, %s2804_s24  ;;  %v1347_v1 = vsub.f32 1.5, %v1346_v55 }
 0x73e   : > { %v1348_v8 = vmul.f32 %v2529_v48, %v1347_v1 }
 0x740   : > { %v1352_v16 = vsel %vm1351_vm7, %v2529_v48, %v1348_v8 }
 0x742   : > { %v1314_v0 = vpop.xlane.xlu0 %1313 }
 0x743   : > { %v1318_v61 = vmul.f32 %v1314_v0, %v3121_v6 }
 0x745   : > { %v1322_v15 = vadd.f32 1e-05, %v1318_v61 }
 0x747   : > { %vm1359_vm14 = vweird.f32 %v1322_v15 }
 0x74a   : > { %v1536_v46 = vpop.permute.xlu2 %1535 }
 0x74b   : > { %v1130_v51 = vpop.xlane.xlu1 %1129  ;;  %v1541_v33 = vsel %vm768_vm9, %v1536_v46, 0 }
 0x752   : > { %v1230_v52 = vpop.permute.xlu2 %1229 }
 0x753   : > { %v1235_v7 = vsel %vm1161_vm13, %v1230_v52, 0  ;;  %v1133_v62 = vpop.xlane.xlu1 %1132 }
 0x754   : > { %2532 = vrcp.f32 %v1133_v62  ;;  %1244 = vmatpush.bf16.msra.mxu0 %v1235_v7 }
 0x755   : > { %2534 = vrsqrt.f32 %v1320_v54 }
 0x756   : > { %2536 = vrcp.f32 %v1130_v51 }
 0x757   : > { %1126 = vadd.xlane.f32.xlu2 %v1125_v57  ;;  %2538 = vrsqrt.f32 %v1322_v15 }
 0x75a   : > { %v2533_v17 = vpop.eup %2532 }
 0x75b   : > { %v1143_v11 = vmul.f32 %v2533_v17, %v3359_v47  ;;  %v2535_v2 = vpop.eup %2534  ;;  %v1365_v47 = vmul.f32 %v1352_v16, %v3316_v14 }
 0x75c   : > { %v1334_v9 = vmul.f32 %v2535_v2, %v1320_v54  ;;  %v2537_v20 = vpop.eup %2536  ;;  %vm1340_vm8 = vweird.f32 %v2535_v2 }
 0x75d   : > { %v1147_v3 = vpack.c.bf16 %v1143_v11, %v1143_v11  ;;  %v1372_v23 = vmul.f32 %v3417_v21, %v1365_v47  ;;  %v1142_v25 = vmul.f32 %v2537_v20, %v3353_v40  ;;  %vm1341_vm11 = vmor %vm1339_vm10, %vm1340_vm8  ;;  %v2539_v42 = vpop.eup %2538 }
 0x75e   : > { %v1335_v19 = vmul.f32 %v2535_v2, %v1334_v9  ;;  %v1354_v37 = vmul.f32 %v2539_v42, %v1322_v15  ;;  %vm1360_vm12 = vweird.f32 %v2539_v42 }
 0x75f   : > { %2277 = vmatmul.msk.bf16.vlgmr.msrb.gmra.mxu3 %vm768_vm9, %v1147_v3  ;;  %v1502_v35 = vpack.c.bf16 %v1372_v23, %v1372_v23  ;;  %v1146_v36 = vpack.c.bf16 %v1142_v25, %v1142_v25  ;;  %vm1361_vm15 = vmor %vm1359_vm14, %vm1360_vm12 }
 0x760   : > { %v1336_v22 = vmul.f32 0.5, %v1335_v19  ;;  %v1355_v63 = vmul.f32 %v2539_v42, %v1354_v37 }
 0x761   : > { %v1560_v18 = vpop.permute.xlu0 %1559 }
 0x762   : > { %v1565_v29 = vsel %vm768_vm9, %v1560_v18, 0  ;;  %v1337_v26 = vsub.f32 1.5, %v1336_v22  ;;  %v1356_v27 = vmul.f32 0.5, %v1355_v63 }
 0x763   : > { %1574 = vmatpush.bf16.xpose.msra.mxu3 %v1565_v29 }
 0x764   : > { %v1338_v39 = vmul.f32 %v2535_v2, %v1337_v26  ;;  %v1357_v45 = vsub.f32 1.5, %v1356_v27 }
 0x766   : > { %v1342_v14 = vsel %vm1341_vm11, %v2535_v2, %v1338_v39  ;;  %v1358_v51 = vmul.f32 %v2539_v42, %v1357_v45  ;;  %vm1946_vm11 = vcmask 523264  }
 0x767   : > { %v1364_v40 = vmul.f32 %v1342_v14, %v3306_v4 }
 0x768   : > { %v1362_v49 = vsel %vm1361_vm15, %v2539_v42, %v1358_v51 }
 0x769   : > { %v1371_v53 = vmul.f32 %v3417_v21, %v1364_v40  ;;  %v1366_v54 = vmul.f32 %v1362_v49, %v3343_v44  ;;  %v1655_v49 = vpack.c.bf16 %v3184_v59, %v3184_v59  ;;  %v1653_v59 = vpack.c.bf16 %v3235_v30, %v3235_v30 }
 0x76b   : > { %v1182_v28 = vpop.permute.xlu1 %1181  ;;  %v1501_v32 = vpack.c.bf16 %v1371_v53, %v1371_v53  ;;  %v1373_v58 = vmul.f32 %v3417_v21, %v1366_v54 }
 0x76c   : > { %v1187_v38 = vsel %vm1161_vm13, %v1182_v28, 0 }
 0x76d   : > { %1196 = vmatpush.bf16.msrb.mxu2 %v1187_v38 }
 0x76f   : > { %2281 = vmatmul.msk.bf16.vlgmr.msra.gmra.mxu3 %vm768_vm9, %v1502_v35  ;;  %v1652_v35 = vpack.c.bf16 %v3159_v31, %v3159_v31 }
 0x770   : > { %2276 = vmatmul.msk.bf16.vlgmr.msrb.gmra.mxu2 %vm768_vm9, %v1146_v36 }
 0x771   : > { %1550 = vmatpush.bf16.xpose.msra.mxu2 %v1541_v33  ;;  %v1657_v36 = vunpack.c.l.b16 %v1652_v35 }
 0x773   : > { %v1658_v39 = vpack.c.b16 %v1657_v36, %v1657_v36 }
 0x780   : > { %2280 = vmatmul.msk.bf16.vlgmr.msra.gmra.mxu2 %vm768_vm9, %v1501_v32 }
 0x788   : > { %v1584_v5 = vpop.permute.xlu2 %1583 }
 0x789   : > { %v1589_v41 = vsel %vm768_vm9, %v1584_v5, 0 }
 0x78a   : > { %1598 = vmatpush.bf16.xpose.msrb.mxu0 %v1589_v41 }
 0x78c   : > { %v1305_v50 = vpop.xlane.xlu0 %1304 }
 0x78d   : > { %v1315_v57 = vmul.f32 %v1305_v50, %v3121_v6  ;;  %v1729_v50 = vunpack.c.l.b16 %v1655_v49 }
 0x78f   : > { %v1319_v0 = vadd.f32 1e-05, %v1315_v57  ;;  %v1730_v54 = vpack.c.b16 %v1729_v50, %v1729_v50 }
 0x791   : > { %vm1329_vm2 = vweird.f32 %v1319_v0 }
 0x796   : > { %v1136_v43 = vpop.xlane.xlu1 %1135 }
 0x797   : > { %2540 = vrcp.f32 %v1136_v43 }
 0x798   : > { %2542 = vrsqrt.f32 %v1319_v0 }
 0x79d   : > { %v2541_v4 = vpop.eup %2540 }
 0x79e   : > { %v1144_v46 = vmul.f32 %v2541_v4, %v3388_v13  ;;  %v1503_v13 = vpack.c.bf16 %v1373_v58, %v1373_v58  ;;  %v2543_v17 = vpop.eup %2542 }
 0x79f   : > { %v1324_v1 = vmul.f32 %v2543_v17, %v1319_v0  ;;  %vm1330_vm0 = vweird.f32 %v2543_v17 }
 0x7a0   : > { %v1148_v48 = vpack.c.bf16 %v1144_v46, %v1144_v46  ;;  %vm1331_vm3 = vmor %vm1329_vm2, %vm1330_vm0 }
 0x7a1   : > { %v1325_v44 = vmul.f32 %v2543_v17, %v1324_v1  ;;  %v1681_v1 = vunpack.c.l.b16 %v1653_v59 }
 0x7a2   : > { %2278 = vmatmul.msk.bf16.vlgmr.msra.gmra.mxu0 %vm768_vm9, %v1148_v48 }
 0x7a3   : > { %v1326_v2 = vmul.f32 0.5, %v1325_v44  ;;  %v1682_v44 = vpack.c.b16 %v1681_v1, %v1681_v1 }
 0x7a5   : > { %v1327_v8 = vsub.f32 1.5, %v1326_v2 }
 0x7a7   : > { %v1328_v18 = vmul.f32 %v2543_v17, %v1327_v8 }
 0x7a9   : > { %v1512_v52 = vpop.permute.xlu0 %1511  ;;  %v1332_v6 = vsel %vm1331_vm3, %v2543_v17, %v1328_v18 }
 0x7aa   : > { %v1517_v55 = vsel %vm768_vm9, %v1512_v52, 0  ;;  %v1363_v16 = vmul.f32 %v1332_v6, %v3381_v56  ;;  %v1654_v56 = vpack.c.bf16 %v3241_v34, %v3241_v34 }
 0x7ac   : > { %v1370_v29 = vmul.f32 %v3417_v21, %v1363_v16  ;;  %v1705_v28 = vunpack.c.l.b16 %v1654_v56 }
 0x7ae   : > { %v1157_v7 = vpop.permute.xlu1 %1156  ;;  %v1500_v19 = vpack.c.bf16 %v1370_v29, %v1370_v29  ;;  %v1706_v33 = vpack.c.b16 %v1705_v28, %v1705_v28 }
 0x7af   : > { %v1163_v62 = vsel %vm1161_vm13, %v1157_v7, 0 }
 0x7b0   : > { %1172 = vmatpush.bf16.msrb.mxu1 %v1163_v62 }
 0x7b2   : > { %2282 = vmatmul.msk.bf16.vlgmr.msrb.gmra.mxu0 %vm768_vm9, %v1503_v13 }
 0x7b4   : > { %1526 = vmatpush.bf16.xpose.msra.mxu1 %v1517_v55 }
 0x7ca   : > { %v1127_v11 = vpop.xlane.xlu2 %1126 }
 0x7cb   : > { %2544 = vrcp.f32 %v1127_v11 }
 0x7d1   : > { %v2545_v3 = vpop.eup %2544 }
 0x7d2   : > { %v1141_v9 = vmul.f32 %v2545_v3, %v3406_v60 }
 0x7d4   : > { %v1145_v10 = vpack.c.bf16 %v1141_v9, %v1141_v9 }
 0x7d6   : > { %2275 = vmatmul.msk.bf16.vlgmr.msrb.gmra.mxu1 %vm768_vm9, %v1145_v10 }
 0x7e2   : > { %v3442_v24 = vpop.f32.mrf.mxu3 }
 0x7e6   : > { %2279 = vmatmul.msk.bf16.vlgmr.msra.gmra.mxu1 %vm768_vm9, %v1500_v19 }
 0x7ea   : > { %v1224_v47 = vpop.f32.mrf.mxu3 }
 0x7f2   : > { %v1576_v20 = vpop.f32.mrf.mxu3 }
 0x7f3   : > { %v3445_v60 = vpop.f32.mrf.mxu2  ;;  %v1610_v22 = vsel %vm768_vm9, %v1576_v20, -inf }
 0x7f4   : > { %1611 = vmax.xlane.f32.xlu1 %v1610_v22 }
 0x7fa   : > { %v1578_v23 = vpop.f32.mrf.mxu3 }
 0x7fb   : > { %v1200_v25 = vpop.f32.mrf.mxu2 }
 0x803   : > { %v1552_v26 = vpop.f32.mrf.mxu2 }
 0x804   : > { %v1607_v21 = vsel %vm768_vm9, %v1552_v26, -inf }
 0x805   : > { %1608 = vmax.xlane.f32.xlu2 %v1607_v21 }
 0x80b   : > { %v1554_v38 = vpop.f32.mrf.mxu2 }
 0x80d   : > { %1707 = vrot.lane.b32.xlu1 %v1706_v33, %s2804_s24 }
 0x815   : > { %1659 = vrot.lane.b32.xlu1 %v1658_v39, %s2804_s24 }
 0x81f   : > { %v3455_v14 = vpop.f32.mrf.mxu0 }
 0x827   : > { %v1248_v40 = vpop.f32.mrf.mxu0 }
 0x82f   : > { %v1600_v53 = vpop.f32.mrf.mxu0 }
 0x830   : > { %v1613_v34 = vsel %vm768_vm9, %v1600_v53, -inf }
 0x831   : > { %1614 = vmax.xlane.f32.xlu2 %v1613_v34 }
 0x837   : > { %v1602_v32 = vpop.f32.mrf.mxu0 }
 0x853   : > { %v3458_v61 = vpop.f32.mrf.mxu1 }
 0x85b   : > { %v1176_v15 = vpop.f32.mrf.mxu1 }
 0x863   : > { %v1528_v5 = vpop.f32.mrf.mxu1 }
 0x864   : > { %v1604_v31 = vsel %vm768_vm9, %v1528_v5, -inf }
 0x865   : > { %1605 = vmax.xlane.f32.xlu2 %v1604_v31 }
 0x867   : > { %v1612_v42 = vpop.xlane.xlu1 %1611 }
 0x868   : > { %v1618_v7 = vsub.f32 %v1576_v20, %v1612_v42 }
 0x86a   : > { %v1624_v55 = vmul.f32 1.442695, %v1618_v7 }
 0x86b   : > { %v1530_v41 = vpop.f32.mrf.mxu1 }
 0x878   : > { %v1609_v37 = vpop.xlane.xlu2 %1608 }
 0x879   : > { %v1617_v63 = vsub.f32 %v1552_v26, %v1609_v37 }
 0x87b   : > { %v1622_v43 = vmul.f32 1.442695, %v1617_v63  ;;  %v2335_v63 = vld [vmem:[%s3053_s8 + $0x8] sm:$0xff] }
 0x87d   : > { %2546 = vpow2.f32 %v1622_v43 }
 0x87f   : > { %v1708_v27 = vpop.permute.xlu1 %1707 }
 0x880   : > { %v1713_v4 = vsel %vm1161_vm13, %v1708_v27, 0 }
 0x881   : > { %1722 = vmatpush.bf16.msrb.mxu3 %v1713_v4 }
 0x883   : > { %v2547_v45 = vpop.eup %2546 }
 0x884   : > { %v1631_v46 = vsel %vm768_vm9, %v2547_v45, 0.0 }
 0x885   : > { %1632 = vadd.xlane.f32.xlu0 %v1631_v46 }
 0x887   : > { %v1660_v48 = vpop.permute.xlu1 %1659 }
 0x888   : > { %v1665_v51 = vsel %vm1161_vm13, %v1660_v48, 0 }
 0x889   : > { %1674 = vmatpush.bf16.msrb.mxu1 %v1665_v51 }
 0x88d   : > { %1793 = vmatpush.bf16.msra.mxu1 %v2335_v63 }
 0x899   : > { %1731 = vrot.lane.b32.xlu0 %v1730_v54, %s2804_s24 }
 0x8a4   : > { %v1615_v58 = vpop.xlane.xlu2 %1614 }
 0x8a5   : > { %v1619_v52 = vsub.f32 %v1600_v53, %v1615_v58 }
 0x8a7   : > { %v1626_v62 = vmul.f32 1.442695, %v1619_v52 }
 0x8a9   : > { %2548 = vpow2.f32 %v1626_v62 }
 0x8aa   : > { %2550 = vpow2.f32 %v1624_v55 }
 0x8af   : > { %v2549_v13 = vpop.eup %2548 }
 0x8b0   : > { %v1637_v57 = vsel %vm768_vm9, %v2549_v13, 0.0  ;;  %v2551_v0 = vpop.eup %2550 }
 0x8b1   : > { %1638 = vadd.xlane.f32.xlu2 %v1637_v57  ;;  %v1634_v17 = vsel %vm768_vm9, %v2551_v0, 0.0 }
 0x8b9   : > { %1635 = vadd.xlane.f32.xlu2 %v1634_v17  ;;  %v2571_v17 = vld [vmem:[#allocation2 + $0x8] sm:$0xff] }
 0x8d1   : > { %1683 = vrot.lane.b32.xlu2 %v1682_v44, %s2804_s24 }
 0x8d8   : > { %v1606_v11 = vpop.xlane.xlu2 %1605 }
 0x8d9   : > { %v1616_v2 = vsub.f32 %v1528_v5, %v1606_v11 }
 0x8db   : > { %v1620_v3 = vmul.f32 1.442695, %v1616_v2 }
 0x8dd   : > { %2552 = vpow2.f32 %v1620_v3 }
 0x8e3   : > { %v2553_v8 = vpop.eup %2552 }
 0x8e4   : > { %v1628_v9 = vsel %vm768_vm9, %v2553_v8, 0.0 }
 0x8f8   : > { %v1633_v10 = vpop.xlane.xlu0 %1632 }
 0x8fa   : > { %1629 = vadd.xlane.f32.xlu2 %v1628_v9 }
 0x90b   : > { %v1732_v18 = vpop.permute.xlu0 %1731 }
 0x90c   : > { %v1737_v6 = vsel %vm1161_vm13, %v1732_v18, 0 }
 0x90d   : > { %1746 = vmatpush.bf16.msra.mxu0 %v1737_v6 }
 0x924   : > { %v1639_v16 = vpop.xlane.xlu2 %1638 }
 0x925   : > { %2554 = vrcp.f32 %v1639_v16 }
 0x926   : > { %2556 = vrcp.f32 %v1633_v10 }
 0x92b   : > { %v2555_v30 = vpop.eup %2554 }
 0x92c   : > { %v1647_v29 = vmul.f32 %v2555_v30, %v2549_v13  ;;  %v1636_v19 = vpop.xlane.xlu2 %1635  ;;  %v2557_v20 = vpop.eup %2556  ;;  %v2570_v13 = vld [vmem:[#allocation2] sm:$0xff] }
 0x92d   : > { %2558 = vrcp.f32 %v1636_v19  ;;  %v1645_v23 = vmul.f32 %v2557_v20, %v2547_v45  ;;  %v2337_v30 = vld [vmem:[%s3073_s21 + $0x8] sm:$0xff] }
 0x92e   : > { %v1651_v47 = vpack.c.bf16 %v1647_v29, %v1647_v29 }
 0x92f   : > { %v1649_v28 = vpack.c.bf16 %v1645_v23, %v1645_v23 }
 0x930   : > { %2286 = vmatmul.msk.bf16.vlgmr.msra.gmra.mxu0 %vm768_vm9, %v1651_v47  ;;  %v2336_v47 = vld [vmem:[%s3073_s21] sm:$0xff] }
 0x933   : > { %v2559_v22 = vpop.eup %2558 }
 0x934   : > { %v1646_v25 = vmul.f32 %v2559_v22, %v2551_v0  ;;  %v1684_v26 = vpop.permute.xlu2 %1683 }
 0x935   : > { %v1689_v56 = vsel %vm1161_vm13, %v1684_v26, 0  ;;  %vm1263_vm13 = vcmask 130048  }
 0x936   : > { %v1650_v21 = vpack.c.bf16 %v1646_v25, %v1646_v25  ;;  %1698 = vmatpush.bf16.msrb.mxu2 %v1689_v56 }
 0x938   : > { %2285 = vmatmul.msk.bf16.vlgmr.msrb.gmra.mxu3 %vm768_vm9, %v1650_v21 }
 0x939   : > { %2284 = vmatmul.msk.bf16.vlgmr.msrb.gmra.mxu2 %vm768_vm9, %v1649_v28 }
 0x93a   : > { %1883 = vmatpush.bf16.msra.mxu2 %v2337_v30 }
 0x93e   : > { %1884 = vmatpush.bf16.msra.mxu2 %v2336_v47 }
 0x96d   : > { %v1630_v38 = vpop.xlane.xlu2 %1629 }
 0x96e   : > { %2560 = vrcp.f32 %v1630_v38 }
 0x974   : > { %v2561_v33 = vpop.eup %2560 }
 0x975   : > { %v1644_v35 = vmul.f32 %v2561_v33, %v2553_v8 }
 0x977   : > { %v1648_v36 = vpack.c.bf16 %v1644_v35, %v1644_v35 }
 0x979   : > { %2283 = vmatmul.msk.bf16.vlgmr.msrb.gmra.mxu1 %vm768_vm9, %v1648_v36 }
 0x9ad   : > { %v1748_v39 = vpop.f32.mrf.mxu0 }
 0x9ae   : > { %v2479_v41 = vpack.i.bf16 %v1748_v39, %v3455_v14 }
 0x9b5   : > { %v1750_v40 = vpop.f32.mrf.mxu0 }
 0x9bb   : > { %v1724_v53 = vpop.f32.mrf.mxu3 }
 0x9bc   : > { %v2474_v34 = vpack.i.bf16 %v1724_v53, %v3442_v24  ;;  %v1700_v32 = vpop.f32.mrf.mxu2  ;;  %v2334_v24 = vld [vmem:[%s3053_s8] sm:$0xff] }
 0x9bd   : > { %v2469_v15 = vpack.i.bf16 %v1700_v32, %v3445_v60  ;;  %1794 = vmatpush.bf16.msra.mxu1 %v2334_v24  ;;  %v2341_v24 = vld [vmem:[%s3067_s30 + $0x18] sm:$0xff] }
 0x9be   : > { %2475 = vrot.lane.b32.xlu0 %v2474_v34, %s2805_s3  ;;  %1954 = vmatpush.bf16.msra.mxu3 %v2341_v24 }
 0x9bf   : > { %2470 = vrot.lane.b32.xlu1 %v2469_v15, %s2806_s13  ;;  %v2487_v15 = vld [vmem:[%s639_s16] ss:$0 sm:$0xff] }
 0x9c3   : > { %v1726_v5 = vpop.f32.mrf.mxu3 }
 0x9c4   : > { %v1702_v31 = vpop.f32.mrf.mxu2 }
 0x9c7   : > { %2480 = vrot.lane.b32.xlu1 %v2479_v41, %s2807_s19 }
 0x9f6   : > { %v1676_v42 = vpop.f32.mrf.mxu1 }
 0x9fe   : > { %v1678_v37 = vpop.f32.mrf.mxu1 }
 0xa30   : > { %v2476_v4 = vpop.permute.xlu0 %2475 }
 0xa31   : > { %v2471_v43 = vpop.permute.xlu1 %2470  ;;  %v2478_v48 = vunpack.i.h.bf16 %v2476_v4  ;;  %v2477_v14 = vunpack.i.l.bf16 %v2476_v4  ;;  %v2488_v4 = vld [vmem:[%s642_s26] ss:$0 sm:$0xff] }
 0xa32   : > { %v2473_v27 = vunpack.i.h.bf16 %v2471_v43  ;;  %v2472_v60 = vunpack.i.l.bf16 %v2471_v43  ;;  %v2340_v43 = vld [vmem:[%s3067_s30 + $0x10] sm:$0xff] }
 0xa33   : > { %1955 = vmatpush.bf16.msra.mxu3 %v2340_v43 }
 0xa34   : > { %v1262_v45 = vsel %vm768_vm9, %v3458_v61, %v2472_v60  ;;  %v1764_v46 = vsel %vm768_vm9, %v1676_v42, %v2473_v27  ;;  %v2339_v27 = vld [vmem:[%s3067_s30 + $0x8] sm:$0xff]  ;;  %v2338_v60 = vld [vmem:[%s3067_s30] sm:$0xff] }
 0xa35   : > { %v1264_v54 = vsel %vm1263_vm13, %v1262_v45, %v2477_v14  ;;  %v1765_v58 = vsel %vm1263_vm13, %v1764_v46, %v2478_v48 }
 0xa37   : > { %1956 = vmatpush.bf16.msra.mxu3 %v2339_v27 }
 0xa39   : > { %v2481_v51 = vpop.permute.xlu1 %2480 }
 0xa3a   : > { %v2483_v49 = vunpack.i.h.bf16 %v2481_v51  ;;  %v2482_v50 = vunpack.i.l.bf16 %v2481_v51 }
 0xa3b   : > { %1957 = vmatpush.bf16.msra.mxu3 %v2338_v60 }
 0xa3c   : > { %v1266_v52 = vsel %vm1265_vm4, %v1264_v54, %v2482_v50  ;;  %v1766_v7 = vsel %vm1265_vm4, %v1765_v58, %v2483_v49 }
 0xa3d   : > { %v1767_v62 = vpack.c.bf16 %v1766_v7, %v1266_v52 }
 0xa3f   : > { %2295 = vmatmul.msk.bf16.vlgmr.msra.gmra.mxu1 %vm665_vm1, %v1767_v62 }
 0xabc   : > { %v1796_v55 = vpop.f32.mrf.mxu1 }
 0xabd   : > { %v3489_v57 = vadd.f32 %v2570_v13, %v1796_v55 }
 0xabf   : > { %v1804_v61 = vsel %vm665_vm1, %v3489_v57, 0.0 }
 0xac0   : > { %1805 = vadd.xlane.f32.xlu0 %v1804_v61 }
 0xac4   : > { %v1798_v0 = vpop.f32.mrf.mxu1 }
 0xac5   : > { %v3493_v59 = vadd.f32 %v2571_v17, %v1798_v0 }
 0xac7   : > { %v1807_v1 = vsel %vm665_vm1, %v3493_v59, 0.0 }
 0xac8   : > { %1808 = vadd.xlane.f32.xlu1 %v1807_v1 }
 0xb33   : > { %v1806_v44 = vpop.xlane.xlu0 %1805 }
 0xb34   : > { %v1810_v11 = vmul.f32 %v1806_v44, %v3080_v12 }
 0xb36   : > { %v1812_v2 = vsub.f32 %v3489_v57, %v1810_v11 }
 0xb38   : > { %v1814_v3 = vmul.f32 %v1812_v2, %v1812_v2 }
 0xb3a   : > { %v1816_v8 = vsel %vm665_vm1, %v1814_v3, 0.0 }
 0xb3b   : > { %1817 = vadd.xlane.f32.xlu2 %v1816_v8  ;;  %v1809_v9 = vpop.xlane.xlu1 %1808 }
 0xb3c   : > { %v1811_v10 = vmul.f32 %v1809_v9, %v3080_v12  ;;  %v2489_v9 = vld [vmem:[%s650_s5] ss:$0 sm:$0xff] }
 0xb3e   : > { %v1813_v18 = vsub.f32 %v3493_v59, %v1811_v10 }
 0xb40   : > { %v1815_v6 = vmul.f32 %v1813_v18, %v1813_v18 }
 0xb42   : > { %v1819_v16 = vsel %vm665_vm1, %v1815_v6, 0.0 }
 0xb43   : > { %1820 = vadd.xlane.f32.xlu2 %v1819_v16 }
 0xbae   : > { %v1818_v29 = vpop.xlane.xlu2 %1817 }
 0xbaf   : > { %v1822_v19 = vmul.f32 %v1818_v29, %v3080_v12 }
 0xbb1   : > { %v1824_v20 = vadd.f32 1e-05, %v1822_v19 }
 0xbb3   : > { %2562 = vrsqrt.f32 %v1824_v20  ;;  %vm1832_vm5 = vweird.f32 %v1824_v20 }
 0xbb6   : > { %v1821_v22 = vpop.xlane.xlu2 %1820 }
 0xbb7   : > { %v1823_v23 = vmul.f32 %v1821_v22, %v3080_v12 }
 0xbb9   : > { %v2563_v25 = vpop.eup %2562  ;;  %v1825_v26 = vadd.f32 1e-05, %v1823_v23 }
 0xbba   : > { %v1827_v56 = vmul.f32 %v2563_v25, %v1824_v20  ;;  %vm1833_vm9 = vweird.f32 %v2563_v25 }
 0xbbb   : > { %2564 = vrsqrt.f32 %v1825_v26  ;;  %vm1834_vm6 = vmor %vm1832_vm5, %vm1833_vm9  ;;  %vm1842_vm8 = vweird.f32 %v1825_v26 }
 0xbbc   : > { %v1828_v21 = vmul.f32 %v2563_v25, %v1827_v56 }
 0xbbe   : > { %v1829_v28 = vmul.f32 0.5, %v1828_v21 }
 0xbc0   : > { %v1830_v38 = vsub.f32 1.5, %v1829_v28 }
 0xbc1   : > { %v2565_v33 = vpop.eup %2564 }
 0xbc2   : > { %v1837_v35 = vmul.f32 %v2565_v33, %v1825_v26  ;;  %v1831_v36 = vmul.f32 %v2563_v25, %v1830_v38  ;;  %vm1843_vm7 = vweird.f32 %v2565_v33 }
 0xbc3   : > { %vm1844_vm10 = vmor %vm1842_vm8, %vm1843_vm7 }
 0xbc4   : > { %v1838_v39 = vmul.f32 %v2565_v33, %v1837_v35  ;;  %v1835_v53 = vsel %vm1834_vm6, %v2563_v25, %v1831_v36 }
 0xbc5   : > { %v1846_v5 = vmul.f32 %v1835_v53, %v1812_v2 }
 0xbc6   : > { %v1839_v40 = vmul.f32 0.5, %v1838_v39 }
 0xbc7   : > { %v1851_v42 = vmul.f32 %v2487_v15, %v1846_v5 }
 0xbc8   : > { %v1840_v34 = vsub.f32 1.5, %v1839_v40 }
 0xbca   : > { %v1841_v32 = vmul.f32 %v2565_v33, %v1840_v34 }
 0xbcc   : > { %v1845_v31 = vsel %vm1844_vm10, %v2565_v33, %v1841_v32 }
 0xbcd   : > { %v1847_v41 = vmul.f32 %v1845_v31, %v1813_v18 }
 0xbcf   : > { %v1852_v37 = vmul.f32 %v2487_v15, %v1847_v41 }
 0xbd1   : > { %v1853_v63 = vpack.c.bf16 %v1852_v37, %v1851_v42 }
 0xbd3   : > { %2304 = vmatmul.msk.bf16.vlgmr.msra.gmra.mxu2 %vm665_vm1, %v1853_v63 }
 0xc56   : > { %v1886_v45 = vpop.f32.mrf.mxu2 }
 0xc57   : > { %v1887_v46 = vadd.f32 %v2488_v4, %v1886_v45 }
 0xc59   : > { %v1893_v48 = vmul.f32 0.044715, %v1887_v46  ;;  %v1891_v1 = vmul.f32 0.5, %v1887_v46 }
 0xc5b   : > { %v1895_v14 = vmul.f32 %v1893_v48, %v1887_v46 }
 0xc5d   : > { %v1897_v51 = vmul.f32 %v1895_v14, %v1887_v46 }
 0xc5e   : > { %v1888_v49 = vpop.f32.mrf.mxu2 }
 0xc5f   : > { %v1899_v50 = vadd.f32 %v1897_v51, %v1887_v46  ;;  %v1889_v54 = vadd.f32 %v2488_v4, %v1888_v49 }
 0xc61   : > { %v1894_v58 = vmul.f32 0.044715, %v1889_v54  ;;  %v1901_v52 = vmul.f32 0.7978846, %v1899_v50  ;;  %v1892_v44 = vmul.f32 0.5, %v1889_v54 }
 0xc63   : > { %v1896_v7 = vmul.f32 %v1894_v58, %v1889_v54  ;;  %2566 = vtanh.f32 %v1901_v52 }
 0xc65   : > { %v1898_v62 = vmul.f32 %v1896_v7, %v1889_v54 }
 0xc67   : > { %v1900_v55 = vadd.f32 %v1898_v62, %v1889_v54 }
 0xc69   : > { %v1902_v13 = vmul.f32 0.7978846, %v1900_v55  ;;  %v2567_v61 = vpop.eup %2566 }
 0xc6a   : > { %v1905_v0 = vadd.f32 1.0, %v2567_v61 }
 0xc6b   : > { %2568 = vtanh.f32 %v1902_v13 }
 0xc6c   : > { %v1907_v2 = vmul.f32 %v1905_v0, %v1891_v1 }
 0xc71   : > { %v2569_v17 = vpop.eup %2568 }
 0xc72   : > { %v1906_v11 = vadd.f32 1.0, %v2569_v17 }
 0xc74   : > { %v1908_v3 = vmul.f32 %v1906_v11, %v1892_v44 }
 0xc76   : > { %v1909_v8 = vpack.c.bf16 %v1908_v3, %v1907_v2 }
 0xc78   : > { %2321 = vmatmul.msk.bf16.vlgmr.msra.gmra.mxu3 %vm1946_vm11, %v1909_v8 }
 0xcfb   : > { %v1959_v10 = vpop.f32.mrf.mxu3 }
 0xcfc   : > { %v1960_v18 = vadd.f32 %v2489_v9, %v1959_v10 }
 0xcfe   : > { %v1964_v6 = vadd.f32 %v1960_v18, %v3489_v57 }
 0xd00   : > { %1966 = vst.msk [vmem:[#allocation2] sm:$0xff] %vm665_vm1, %v1964_v6 }
 0xd03   : > { %v1961_v16 = vpop.f32.mrf.mxu3 }
 0xd04   : > { %v1962_v30 = vadd.f32 %v2489_v9, %v1961_v16  ;;  %1971 = sbr.rel (%p2322_p10) target bundleno = 3612 (0xe1c), region = 88 }
 0xd06   : > { %v1965_v29 = vadd.f32 %v1962_v30, %v3493_v59 }
 0xd08   : > { %1967 = vst.msk [vmem:[#allocation2 + $0x8] sm:$0xff] %vm665_vm1, %v1965_v29 }
 0xd09   : > { %v1973_v19 = vsel %vm665_vm1, %v1964_v6, 0.0  ;;  %v1976_v47 = vsel %vm665_vm1, %v1965_v29, 0.0  ;;  %v2572_v37 = vld [vmem:[%s3679_s11] ss:$0 sm:$0xff] }
 0xd0a   : > { %1974 = vadd.xlane.f32.xlu0 %v1973_v19 }
 0xd12   : > { %1977 = vadd.xlane.f32.xlu0 %v1976_v47 }
 0xd7d   : > { %v1975_v20 = vpop.xlane.xlu0 %1974 }
 0xd7e   : > { %v1979_v57 = vmul.f32 %v1975_v20, %v3080_v12 }
 0xd80   : > { %v1981_v22 = vsub.f32 %v1964_v6, %v1979_v57 }
 0xd82   : > { %v1983_v23 = vmul.f32 %v1981_v22, %v1981_v22 }
 0xd84   : > { %v1985_v25 = vsel %vm665_vm1, %v1983_v23, 0.0 }
 0xd85   : > { %1986 = vadd.xlane.f32.xlu1 %v1985_v25  ;;  %v1978_v59 = vpop.xlane.xlu0 %1977 }
 0xd86   : > { %v1980_v26 = vmul.f32 %v1978_v59, %v3080_v12 }
 0xd88   : > { %v1982_v56 = vsub.f32 %v1965_v29, %v1980_v26 }
 0xd8a   : > { %v1984_v21 = vmul.f32 %v1982_v56, %v1982_v56 }
 0xd8c   : > { %v1988_v28 = vsel %vm665_vm1, %v1984_v21, 0.0 }
 0xd8d   : > { %1989 = vadd.xlane.f32.xlu1 %v1988_v28 }
 0xdf8   : > { %v1987_v38 = vpop.xlane.xlu1 %1986 }
 0xdf9   : > { %v1991_v33 = vmul.f32 %v1987_v38, %v3080_v12 }
 0xdfb   : > { %v1993_v35 = vadd.f32 1e-05, %v1991_v33 }
 0xdfd   : > { %2573 = vrsqrt.f32 %v1993_v35  ;;  %vm2001_vm14 = vweird.f32 %v1993_v35 }
 0xe00   : > { %v1990_v36 = vpop.xlane.xlu1 %1989 }
 0xe01   : > { %v1992_v39 = vmul.f32 %v1990_v36, %v3080_v12 }
 0xe03   : > { %v2574_v40 = vpop.eup %2573  ;;  %v1994_v53 = vadd.f32 1e-05, %v1992_v39 }
 0xe04   : > { %v1996_v34 = vmul.f32 %v2574_v40, %v1993_v35  ;;  %vm2002_vm12 = vweird.f32 %v2574_v40 }
 0xe05   : > { %2575 = vrsqrt.f32 %v1994_v53  ;;  %vm2003_vm15 = vmor %vm2001_vm14, %vm2002_vm12  ;;  %vm2011_vm2 = vweird.f32 %v1994_v53 }
 0xe06   : > { %v1997_v32 = vmul.f32 %v2574_v40, %v1996_v34 }
 0xe08   : > { %v1998_v15 = vmul.f32 0.5, %v1997_v32 }
 0xe0a   : > { %v1999_v5 = vsub.f32 1.5, %v1998_v15 }
 0xe0b   : > { %v2576_v31 = vpop.eup %2575 }
 0xe0c   : > { %v2000_v41 = vmul.f32 %v2574_v40, %v1999_v5  ;;  %v2006_v42 = vmul.f32 %v2576_v31, %v1994_v53  ;;  %vm2012_vm0 = vweird.f32 %v2576_v31 }
 0xe0d   : > { %vm2013_vm3 = vmor %vm2011_vm2, %vm2012_vm0 }
 0xe0e   : > { %v2004_v12 = vsel %vm2003_vm15, %v2574_v40, %v2000_v41  ;;  %v2007_v63 = vmul.f32 %v2576_v31, %v2006_v42 }
 0xe0f   : > { %v2015_v24 = vmul.f32 %v2004_v12, %v1981_v22 }
 0xe10   : > { %v2008_v43 = vmul.f32 0.5, %v2007_v63 }
 0xe11   : > { %v2020_v27 = vmul.f32 %v2572_v37, %v2015_v24 }
 0xe12   : > { %v2009_v60 = vsub.f32 1.5, %v2008_v43 }
 0xe13   : > { %2022 = vst.msk [vmem:[%s3075_s23] sm:$0xff] %vm665_vm1, %v2020_v27 }
 0xe14   : > { %v2010_v4 = vmul.f32 %v2576_v31, %v2009_v60 }
 0xe16   : > { %v2014_v45 = vsel %vm2013_vm3, %v2576_v31, %v2010_v4 }
 0xe17   : > { %v2016_v46 = vmul.f32 %v2014_v45, %v1982_v56 }
 0xe19   : > { %v2021_v48 = vmul.f32 %v2572_v37, %v2016_v46 }
 0xe1b   : > { %2023 = vst.msk [vmem:[%s3075_s23 + $0x8] sm:$0xff] %vm665_vm1, %v2021_v48 }
 0xe1c PF: > { %s2342_s17 = sshll.u32 %s2781_s28, 4  ;;  %s3681_s0 = sld [smem:[#allocation38_spill]] }
 0xe1d   : > { %s2037_s2 = sshll.u32 %s3075_s23, 4  ;;  %s3682_s7 = sand.u32 1, %s2757_s22   ;;  %s2038_s2 = int_to_ptr.vmem [resolvable:$true] %s2037_s2 }
 0xe1e   : > { %s2025_s25 = scalar_lea.sflag [#allocation5], %s3682_s7 }
 0xe22   : > { %s2036_s1 = scalar_lea.hbm %s3681_s0, %s2342_s17  ;;  %s2687_s28 = scalar_lea.hbm %s3681_s0, 32 }
 0xe23   : > { %s2039_s4 = sshll.u32 %s2036_s1, 4  ;;  %s2040_s4 = int_to_ptr.hbm [resolvable:$true] %s2039_s4 }
 0xe24   : > { %s2681_s29 = sshra.s32 %s2040_s4, 4  ;;  %s2682_s29 = int_to_ptr.hbm [resolvable:$true] %s2681_s29 }
 0xe25   : > { %s2683_s24 = scalar_lea.hbm %s2682_s29, 16  ;;  %p2688_p1 = scmp.lt.s32.totalorder %s2682_s29, %s3681_s0 }
 0xe26   : > { %p2684_p11 = scmp.ne.s32.totalorder %s2682_s29, %s2683_s24  ;;  %p2689_p4 = scmp.lt.s32.totalorder %s2687_s28, %s2683_s24 }
 0xe28   : > { %p2685_p13 = pnand %p2684_p11, %p2966_p12  ;;  %p2690_p3 = por %p2689_p4, %p2688_p1 }
 0xe2a   : > { %p2686_p0 = pneg %p2685_p13 }
 0xe2c   : > { %p2691_p5 = pnand %p2690_p3, %p2686_p0 }
 0xe2e   : > { %2694 = shalt.err (!%p2691_p5)
}
 0xe2f   : > { %s2808_s23 = smov 128  }
 0xe30   : > { %2349 = dma.vmem_to_hbm [thread:$0]  (%p2966_p12), %s2038_s2, 256, %s2040_s4, %s2025_s25, %s2808_s23, %s2808_s23, %s2806_s13  }
 0xe31 PF: > { %s3683_s15 = sld [smem:[#allocation19_spill]] }
 0xe32   : > { %s3684_s9 = sld [smem:[#allocation13_spill]] }
 0xe37   : > { %p2366_p6 = scmp.ge.s32.totalorder %s3683_s15, 2 }
 0xe38   : > { %s2054_s18 = sand.u32 1, %s3684_s9  }
 0xe39   : > { %p2362_p7 = pnand %p2366_p6, %p2974_p2  ;;  %s2055_s10 = scalar_lea.sflag [#allocation5], %s2054_s18 }
 0xe3b   : > { %p2363_p9 = pneg %p2362_p7 }
 0xe3d   : > { %2748 = dma.done.wait (%p2363_p9), %s2055_s10, 256  }
 0xe3e   : > { %2750 = vsyncadd (%p2363_p9), %s2055_s10, 4294967040  ;;  %s31_s13 = sadd.s32 1, %s3683_s15   ;;  %s3686_s16 = sld [smem:[#allocation14_spill]] }
 0xe3f   : > { %p28_p8 = scmp.ge.s32.totalorder %s31_s13, 6   ;;  %s3687_s23 = sld [smem:[#allocation23_spill]] }
 0xe40   : > { %s3688_s24 = sld [smem:[#allocation15_spill]]  ;;  %s3695_s21 = smov %s2757_s22 }
 0xe41   : > { %s3689_s25 = sld [smem:[#allocation16_spill]] }
 0xe42   : > { %s3690_s26 = sld [smem:[#allocation22_spill]]  ;;  %30 = sbr.rel (!%p28_p8) target bundleno = 25 (0x19), region = 169 }
 0xe43   : > { %s3691_s27 = sld [smem:[#allocation17_spill]] }
 0xe44   : > { %s3692_s28 = sld [smem:[#allocation18_spill]]  ;;  %s3696_s22 = smov %s3686_s16 }
 0xe45   : > { %s3693_s29 = sld [smem:[#allocation20_spill]] }
 0xe46   : > { %s3694_s30 = sld [smem:[#allocation21_spill]] }
 0xe47   :  { %2061 = vsyncpa [#allocation4], 1 }
 0xe48   :  { %2063 = vsyncpa [#allocation4 + $0x1], 1 }
 0xe49   :  { %2064 = vsyncpa [#allocation7], 1 }
 0xe4a   :  { %2066 = vsyncpa [#allocation7 + $0x1], 1 }
 0xe4b   :  { %2067 = vsyncpa [#allocation5], 1 }
 0xe4c   :  { %2069 = vsyncpa [#allocation5 + $0x1], 1 }

</bundles_post_ra>
